<compile_context>
chip_gen: v7x
topology: tpu7x:2x2x1
jax: 0.10.0
libtpu: 0.0.40
codegen_flags: <defaults>
</compile_context>

<pallas_src>
import functools

import jax
import jax.numpy as jnp
from jax import lax
from jax.experimental import pallas as pl
from jax.experimental.pallas import tpu as pltpu

_EPS = 1e-3
_VMEM_LIMIT = 48 * 1024 * 1024  # > default scoped limit (16M v5e / 32M v6e,v7x),
                                # safely < v7x physical 64 MiB.
_PAR2 = pltpu.CompilerParams(dimension_semantics=("parallel", "parallel"),
                             vmem_limit_bytes=_VMEM_LIMIT)
_GRU_CP = pltpu.CompilerParams(dimension_semantics=("parallel", "arbitrary"),
                               vmem_limit_bytes=_VMEM_LIMIT)


def _round_up(a, m):
    return (a + m - 1) // m * m


def _choose_tiles(T, K):
    # Halo block rows: enough for the widest conv tap on either side, >= 8.
    hb = _round_up(max(K // 2, 2), 8)
    # Larger tiles amortize the ~0.35us/grid-step overhead (feedback: 256-512
    # on v5e/v6e); 256 keeps double-buffered tiles inside v7x's 64 MiB too.
    tt = 256 if T >= 256 else _round_up(T, 8)
    tt = _round_up(max(tt, hb), hb)
    return tt, hb


# --------------------------------------------------------------------------
# Kernel 1: fused conv1d bank (all kernel sizes 1..K) + BN partial statistics
# --------------------------------------------------------------------------
def _bank_kernel(left_ref, cur_ref, right_ref, w_ref, o_ref, st_ref,
                 *, T, TT, HB, PL, K):
    i = pl.program_id(1)
    t0 = i * TT
    # Thin-halo window: (HB | TT | HB) rows of one batch element.
    window = jnp.concatenate([left_ref[0], cur_ref[0], right_ref[0]], axis=0)
    rows = TT + 2 * HB
    t_g = t0 - HB + lax.broadcasted_iota(jnp.int32, (rows, 1), 0)
    window = jnp.where(jnp.logical_and(t_g >= 0, t_g < T), window, 0.0)
    # One deep matmul: K shifted views lane-concatenated -> (TT, K*Cin) slab
    # against the aggregated (K*Cin, K*Cout) bank weight (bf16 operands).
    base = HB - PL
    slab = jnp.concatenate(
        [window[base + u:base + u + TT] for u in range(K)], axis=1)
    acc = jnp.dot(slab.astype(jnp.bfloat16), w_ref[...],
                  preferred_element_type=jnp.float32)
    o_ref[0] = acc
    # masked per-tile BN partial sums (reduced across tiles in JAX)
    row = lax.broadcasted_iota(jnp.int32, (TT, 1), 0)
    yv = jnp.where((t0 + row) < T, acc, 0.0)
    st_ref[0, 0] = jnp.concatenate(
        [jnp.sum(yv, axis=0, keepdims=True),
         jnp.sum(yv * yv, axis=0, keepdims=True)], axis=0)


# --------------------------------------------------------------------------
# Kernel 2/3: BN(prev stage)+ReLU [+ maxpool(2,1)] + 3-tap conv projection
#             + BN partial statistics of the new pre-BN output
# --------------------------------------------------------------------------
def _proj_kernel(left_ref, cur_ref, right_ref, sc_ref, sh_ref, w_ref,
                 o_ref, st_ref, *, pool, T, TT, HB):
    i = pl.program_id(1)
    t0 = i * TT
    window = jnp.concatenate([left_ref[0], cur_ref[0], right_ref[0]], axis=0)
    rows = TT + 2 * HB
    t_g = t0 - HB + lax.broadcasted_iota(jnp.int32, (rows, 1), 0)
    valid = jnp.logical_and(t_g >= 0, t_g < T)
    a = jnp.maximum(window * sc_ref[...] + sh_ref[...], 0.0)  # BN + ReLU (prev)
    a = jnp.where(valid, a, 0.0)
    # p covers times t0-1 .. t0+TT (window rows HB-1 .. HB+TT).
    if pool:
        # MaxPool1d(kernel=2, stride=1) after right zero pad (post-ReLU => 0 ok),
        # then conv zero padding outside [0, T).
        p = jnp.maximum(a[HB - 1:HB + TT + 1], a[HB:HB + TT + 2])
        p = jnp.where(valid[HB - 1:HB + TT + 1], p, 0.0)
    else:
        p = a[HB - 1:HB + TT + 1]
    # One deep matmul: 3 shifted views -> (TT, 3*Cin) slab, (3*Cin, Cout) weight.
    slab = jnp.concatenate([p[j:j + TT] for j in range(3)], axis=1)
    acc = jnp.dot(slab.astype(jnp.bfloat16), w_ref[...],
                  preferred_element_type=jnp.float32)
    o_ref[0] = acc
    row = lax.broadcasted_iota(jnp.int32, (TT, 1), 0)
    yv = jnp.where((t0 + row) < T, acc, 0.0)
    st_ref[0, 0] = jnp.concatenate(
        [jnp.sum(yv, axis=0, keepdims=True),
         jnp.sum(yv * yv, axis=0, keepdims=True)], axis=0)


# --------------------------------------------------------------------------
# Kernel 4: BN(last projection, no ReLU) + residual + highway stack (fused
#           Wh|Wt) + bidirectional GRU input projections (fused (F, 6H))
# --------------------------------------------------------------------------
def _tail_kernel(*refs, nhw, F, H3):
    y_ref, inp_ref, sc_ref, sh_ref, wi_ref, bi_ref = refs[:6]
    hw_refs = refs[6:6 + 2 * nhw]
    o_ref = refs[6 + 2 * nhw]
    x = y_ref[0] * sc_ref[...] + sh_ref[...]      # BN, no activation
    x = x + inp_ref[0]                            # residual connection
    # TODO(synk): pre_highway Linear omitted (highway_features ==
    #             conv_projections[-1] is asserted in prepare_params).
    for l in range(nhw):
        w = hw_refs[2 * l][...]                   # bf16 (F, 2F) = [Wh | Wt]
        b = hw_refs[2 * l + 1][...]               # f32  (1, 2F)
        ht = jnp.dot(x.astype(jnp.bfloat16), w,
                     preferred_element_type=jnp.float32) + b
        hpart = jnp.maximum(ht[:, :F], 0.0)
        tgate = jax.nn.sigmoid(ht[:, F:])
        x = hpart * tgate + x * (1.0 - tgate)
    xg = jnp.dot(x.astype(jnp.bfloat16), wi_ref[...],
                 preferred_element_type=jnp.float32) + bi_ref[...]
    o_ref[0, 0] = xg[:, :H3]                      # forward-direction gates
    o_ref[1, 0] = xg[:, H3:]                      # backward-direction gates


# --------------------------------------------------------------------------
# Kernel 5: bidirectional GRU recurrence. Grid = (direction, time-chunk); the
#           hidden state lives in VMEM scratch across chunks; only the fused
#           (B,H)x(H,3H) recurrent matmul remains inside the serial loop.
#           The direction axis is "parallel" (independent; split on v7x).
# --------------------------------------------------------------------------
def _gru_kernel(xg_ref, whh_ref, bhh_ref, o_ref, h_scr, *, T, TT, H):
    d = pl.program_id(0)
    i = pl.program_id(1)
    NT = pl.num_programs(1)

    @pl.when(i == 0)
    def _init():
        h_scr[...] = jnp.zeros_like(h_scr)

    chunk = d * (NT - 1) + (1 - 2 * d) * i        # i (fwd) or NT-1-i (bwd)
    base = chunk * TT
    whh = whh_ref[...]                            # bf16 (H, 3H) = [Whr|Whz|Whn]
    bhh = bhh_ref[...]                            # f32  (1, 3H)

    def step(tau, carry):
        idx = d * (TT - 1) + (1 - 2 * d) * tau    # local time index in chunk
        xg = xg_ref[idx]                          # (B, 3H) precomputed input gates
        h = h_scr[...]
        hg = jnp.dot(h.astype(jnp.bfloat16), whh,
                     preferred_element_type=jnp.float32) + bhh
        r = jax.nn.sigmoid(xg[:, :H] + hg[:, :H])
        z = jax.nn.sigmoid(xg[:, H:2 * H] + hg[:, H:2 * H])
        n = jnp.tanh(xg[:, 2 * H:] + r * hg[:, 2 * H:])
        h_new = (1.0 - z) * n + z * h
        h_new = jnp.where(base + idx < T, h_new, h)   # ignore padded time steps
        h_scr[...] = h_new
        o_ref[idx] = h_new
        return carry

    lax.fori_loop(0, TT, step, 0)


# --------------------------------------------------------------------------
# pallas_call wrappers
# --------------------------------------------------------------------------
def _halo_specs(TT, HB, C, NH):
    r = TT // HB
    left = pl.BlockSpec((1, HB, C), lambda b, i: (b, jnp.maximum(i * r - 1, 0), 0))
    cur = pl.BlockSpec((1, TT, C), lambda b, i: (b, i, 0))
    right = pl.BlockSpec(
        (1, HB, C), lambda b, i: (b, jnp.minimum((i + 1) * r, NH - 1), 0))
    return left, cur, right


def _bank_conv(x, w_flat, T, TT, HB, PL, K):
    B, T_pad, Cin = x.shape
    NT = T_pad // TT
    NH = T_pad // HB
    C1 = w_flat.shape[1]
    left, cur, right = _halo_specs(TT, HB, Cin, NH)
    return pl.pallas_call(
        functools.partial(_bank_kernel, T=T, TT=TT, HB=HB, PL=PL, K=K),
        grid=(B, NT),
        in_specs=[left, cur, right,
                  pl.BlockSpec((K * Cin, C1), lambda b, i: (0, 0))],
        out_specs=(pl.BlockSpec((1, TT, C1), lambda b, i: (b, i, 0)),
                   pl.BlockSpec((1, 1, 2, C1), lambda b, i: (b, i, 0, 0))),
        out_shape=(jax.ShapeDtypeStruct((B, T_pad, C1), jnp.float32),
                   jax.ShapeDtypeStruct((B, NT, 2, C1), jnp.float32)),
        compiler_params=_PAR2,
    )(x, x, x, w_flat)


def _proj_conv(y, scale, shift, w_flat, T, TT, HB, pool):
    B, T_pad, Cin = y.shape
    NT = T_pad // TT
    NH = T_pad // HB
    Cout = w_flat.shape[1]
    left, cur, right = _halo_specs(TT, HB, Cin, NH)
    return pl.pallas_call(
        functools.partial(_proj_kernel, pool=pool, T=T, TT=TT, HB=HB),
        grid=(B, NT),
        in_specs=[left, cur, right,
                  pl.BlockSpec((1, Cin), lambda b, i: (0, 0)),
                  pl.BlockSpec((1, Cin), lambda b, i: (0, 0)),
                  pl.BlockSpec((3 * Cin, Cout), lambda b, i: (0, 0))],
        out_specs=(pl.BlockSpec((1, TT, Cout), lambda b, i: (b, i, 0)),
                   pl.BlockSpec((1, 1, 2, Cout), lambda b, i: (b, i, 0, 0))),
        out_shape=(jax.ShapeDtypeStruct((B, T_pad, Cout), jnp.float32),
                   jax.ShapeDtypeStruct((B, NT, 2, Cout), jnp.float32)),
        compiler_params=_PAR2,
    )(y, y, y, scale, shift, w_flat)


def _tail(y, xin, scale, shift, wi, bi, hw_list, T, TT, H):
    B, T_pad, Cp = y.shape
    F = xin.shape[-1]
    NT = T_pad // TT
    H3 = 3 * H
    nhw = len(hw_list)
    in_specs = [pl.BlockSpec((1, TT, Cp), lambda b, i: (b, i, 0)),
                pl.BlockSpec((1, TT, F), lambda b, i: (b, i, 0)),
                pl.BlockSpec((1, Cp), lambda b, i: (0, 0)),
                pl.BlockSpec((1, Cp), lambda b, i: (0, 0)),
                pl.BlockSpec((F, 2 * H3), lambda b, i: (0, 0)),
                pl.BlockSpec((1, 2 * H3), lambda b, i: (0, 0))]
    args = [y, xin, scale, shift, wi, bi]
    for whw, bhw in hw_list:
        in_specs.append(pl.BlockSpec((F, 2 * F), lambda b, i: (0, 0)))
        in_specs.append(pl.BlockSpec((1, 2 * F), lambda b, i: (0, 0)))
        args += [whw, bhw]
    return pl.pallas_call(
        functools.partial(_tail_kernel, nhw=nhw, F=F, H3=H3),
        grid=(B, NT),
        in_specs=in_specs,
        out_specs=pl.BlockSpec((2, 1, TT, H3), lambda b, i: (0, b, i, 0)),
        out_shape=jax.ShapeDtypeStruct((2, B, T_pad, H3), jnp.float32),
        compiler_params=_PAR2,
    )(*args)


def _bigru(xg, whh, bhh, T, TT, H):
    _, T_pad, B, H3 = xg.shape
    NT = T_pad // TT

    def dmap(d, i):
        c = d * (NT - 1) + (1 - 2 * d) * i
        return (d, c, 0, 0)

    return pl.pallas_call(
        functools.partial(_gru_kernel, T=T, TT=TT, H=H),
        grid=(2, NT),
        in_specs=[pl.BlockSpec((None, TT, B, H3), dmap),
                  pl.BlockSpec((None, H, H3), lambda d, i: (d, 0, 0)),
                  pl.BlockSpec((None, 1, H3), lambda d, i: (d, 0, 0))],
        out_specs=pl.BlockSpec((None, TT, B, H), dmap),
        out_shape=jax.ShapeDtypeStruct((2, T_pad, B, H), jnp.float32),
        scratch_shapes=[pltpu.VMEM((B, H), jnp.float32)],
        compiler_params=_GRU_CP,
    )(xg, whh, bhh)


# --------------------------------------------------------------------------
# One-time parameter preparation (fused / aggregated weight forms, bf16).
# Hoisted OUT of the jitted per-call forward (feedback).
# --------------------------------------------------------------------------
def prepare_params(params, K):
    prepped = {}

    # conv bank: aggregate all kernel sizes into one (K*Cin, K*Cout) slab
    c_out, c_in, _ = params["bank"][0][0].shape
    PL = (K - 1) // 2
    w_all = jnp.zeros((K, c_in, K * c_out), jnp.float32)
    gammas, betas = [], []
    for k in range(1, K + 1):
        w, g, b = params["bank"][k - 1]           # torch conv weight (Cout, Cin, k)
        for j in range(k):
            u = j + PL - (k - 1) // 2             # global tap index
            w_all = w_all.at[u, :, (k - 1) * c_out:k * c_out].set(w[:, :, j].T)
        gammas.append(g)
        betas.append(b)
    prepped["bank_w"] = w_all.reshape(K * c_in, K * c_out).astype(jnp.bfloat16)
    prepped["bank_g"] = jnp.concatenate(gammas)
    prepped["bank_b"] = jnp.concatenate(betas)

    # conv projections: (Cout, Cin, 3) -> flattened (3*Cin, Cout) bf16 slab
    prepped["proj"] = []
    for (w, g, b) in params["proj"]:
        wp = jnp.concatenate([w[:, :, j].T for j in range(3)], axis=0)
        prepped["proj"].append((wp.astype(jnp.bfloat16), g, b))

    # highway layers: fused [Wh | Wt] (bf16), [bh | bt] (f32)
    prepped["highways"] = [
        (jnp.concatenate([wh, wt], axis=1).astype(jnp.bfloat16),
         jnp.concatenate([bh, bt], axis=1))
        for (wh, bh, wt, bt) in params["highways"]]

    # GRU: fused input weights for both directions, per-direction recurrent
    def direction(p):
        wi = jnp.concatenate([p["wir"], p["wiz"], p["win"]], axis=1)
        bi = jnp.concatenate([p["bir"], p["biz"], p["bin"]], axis=1)
        wh = jnp.concatenate([p["whr"], p["whz"], p["whn"]], axis=1)
        bh = jnp.concatenate([p["bhr"], p["bhz"], p["bhn"]], axis=1)
        return wi, bi, wh, bh
    wif, bif, whf, bhf = direction(params["gru_fwd"])
    wib, bib, whb, bhb = direction(params["gru_bwd"])
    prepped["gru_wi"] = jnp.concatenate([wif, wib], axis=1).astype(jnp.bfloat16)
    prepped["gru_bi"] = jnp.concatenate([bif, bib], axis=1)
    prepped["gru_whh"] = jnp.stack([whf, whb], axis=0).astype(jnp.bfloat16)
    prepped["gru_bhh"] = jnp.stack([bhf, bhb], axis=0)

    # shape invariants assumed by the fused tail kernel (residual + no pre_highway)
    c_last = params["proj"][-1][0].shape[0]
    F = params["highways"][0][0].shape[0]
    assert c_last == c_in, "residual add needs conv_projections[-1] == in_features"
    assert F == c_last, "pre_highway omitted: needs highway_features == conv_projections[-1]"
    return prepped


def _bn_affine(st, count, gamma, beta):
    s = jnp.sum(st, axis=(0, 1))                  # (2, C)
    mean = s[0] / count
    var = jnp.maximum(s[1] / count - mean * mean, 0.0)   # biased var (torch BN train)
    scale = gamma * lax.rsqrt(var + _EPS)
    shift = beta - mean * scale
    return scale.reshape(1, -1), shift.reshape(1, -1)


# --------------------------------------------------------------------------
# Full CBHG forward
# --------------------------------------------------------------------------
def cbhg_forward(inputs, prepped, K):
    B, T, _ = inputs.shape
    TT, HB = _choose_tiles(T, K)
    T_pad = _round_up(T, TT)
    x = inputs if T_pad == T else jnp.pad(inputs, ((0, 0), (0, T_pad - T), (0, 0)))
    PL = (K - 1) // 2

    # conv1d bank fused over all kernel sizes -> concatenated pre-BN output
    y, st = _bank_conv(x, prepped["bank_w"], T, TT, HB, PL, K)
    scale, shift = _bn_affine(st, B * T, prepped["bank_g"], prepped["bank_b"])

    # maxpool (first projection only) + conv projections; BN(+ReLU) of the
    # previous stage is folded into each projection kernel as scale/shift
    for idx, (wp, g, b) in enumerate(prepped["proj"]):
        y, st = _proj_conv(y, scale, shift, wp, T, TT, HB, pool=(idx == 0))
        scale, shift = _bn_affine(st, B * T, g, b)

    # BN(last projection, no ReLU) + residual + highways + GRU input projections
    H = prepped["gru_whh"].shape[1]
    xg = _tail(y, x, scale, shift, prepped["gru_wi"], prepped["gru_bi"],
               prepped["highways"], T, TT, H)     # (2, B, T_pad, 3H)

    # TODO(synk): gates are re-laid-out to time-major with one XLA transpose;
    #             an in-kernel (B,TT)->(TT,B) relayout was judged lowering-risky.
    xg = jnp.transpose(xg, (0, 2, 1, 3))          # (2, T_pad, B, 3H)
    out = _bigru(xg, prepped["gru_whh"], prepped["gru_bhh"], T, TT, H)
    out = jnp.concatenate([out[0], out[1]], axis=-1)   # (T_pad, B, 2H)
    return jnp.transpose(out, (1, 0, 2))[:, :T]   # (B, T, 2H)


# --------------------------------------------------------------------------
# Deterministic parameter init (shapes follow the PyTorch __init__)
# --------------------------------------------------------------------------
def init_params(key, in_features, K, conv_bank_features, conv_projections,
                highway_features, gru_features, num_highways):
    keys = list(jax.random.split(key, 256))
    ki = iter(keys)

    def rnd(shape, scale=0.1):
        return scale * jax.random.normal(next(ki), shape, dtype=jnp.float32)

    params = {}
    params["bank"] = []
    for k in range(1, K + 1):
        w = rnd((conv_bank_features, in_features, k))
        params["bank"].append((w, jnp.ones((conv_bank_features,), jnp.float32),
                               jnp.zeros((conv_bank_features,), jnp.float32)))
    in_sizes = [K * conv_bank_features] + conv_projections[:-1]
    params["proj"] = []
    for cin, cout in zip(in_sizes, conv_projections):
        w = rnd((cout, cin, 3))
        params["proj"].append((w, jnp.ones((cout,), jnp.float32),
                               jnp.zeros((cout,), jnp.float32)))
    F = highway_features
    params["highways"] = []
    for _ in range(num_highways):
        wh = rnd((F, F))
        wt = rnd((F, F))
        bh = jnp.zeros((1, F), jnp.float32)
        bt = jnp.full((1, F), -1.0, jnp.float32)
        params["highways"].append((wh, bh, wt, bt))
    H = gru_features

    def gru_dir():
        return {
            "wir": rnd((F, H)), "wiz": rnd((F, H)), "win": rnd((F, H)),
            "whr": rnd((H, H)), "whz": rnd((H, H)), "whn": rnd((H, H)),
            "bir": rnd((1, H)), "biz": rnd((1, H)), "bin": rnd((1, H)),
            "bhr": rnd((1, H)), "bhz": rnd((1, H)), "bhn": rnd((1, H)),
        }
    params["gru_fwd"] = gru_dir()
    params["gru_bwd"] = gru_dir()
    return params


if __name__ == "__main__":
    B, T_len, D = 2, 8, 32
    K = 4
    conv_bank_features = 32
    conv_projections = [32, 32]      # last projection == in_features (residual add)
    highway_features = 32            # == conv_projections[-1] -> no pre_highway
    gru_features = 32                # == highway_features (GRU input size)
    num_highways = 2

    key = jax.random.PRNGKey(0)
    pkey, xkey = jax.random.split(key)
    params = init_params(pkey, D, K, conv_bank_features, conv_projections,
                         highway_features, gru_features, num_highways)
    prepped = prepare_params(params, K)   # weight fusion hoisted out of jit
    inputs = jax.random.normal(xkey, (B, T_len, D), dtype=jnp.float32)

    fwd = jax.jit(functools.partial(cbhg_forward, K=K))
    out = jax.block_until_ready(fwd(inputs, prepped))
    assert out.shape == (B, T_len, 2 * gru_features), out.shape
    assert bool(jnp.all(jnp.isfinite(out)))
    print("KERNEL_OK")
</pallas_src>

<mosaic_0001>
module attributes {stable_mosaic.version = 11 : i64} {
  func.func @_bank_kernel(%arg0: i32, %arg1: i32, %arg2: memref<1x8x32xf32, #tpu.memory_space<vmem>>, %arg3: memref<1x8x32xf32, #tpu.memory_space<vmem>>, %arg4: memref<1x8x32xf32, #tpu.memory_space<vmem>>, %arg5: memref<128x128xbf16, #tpu.memory_space<vmem>>, %arg6: memref<1x8x128xf32, #tpu.memory_space<vmem>>, %arg7: memref<1x1x2x128xf32, #tpu.memory_space<vmem>>) attributes {dimension_semantics = [#tpu.dimension_semantics<parallel>, #tpu.dimension_semantics<parallel>], iteration_bounds = array<i64: 2, 1>, scalar_prefetch = 0 : i64, scratch_operands = 0 : i64, tpu.core_type = #tpu.core_type<tc>, window_params = [{transform_indices = @transform_0, window_bounds = array<i64: 1, 8, 32>}, {transform_indices = @transform_1, window_bounds = array<i64: 1, 8, 32>}, {transform_indices = @transform_2, window_bounds = array<i64: 1, 8, 32>}, {pipeline_mode = #tpu.pipeline_mode<synchronous>, transform_indices = @transform_3, window_bounds = array<i64: 128, 128>}, {transform_indices = @transform_4, window_bounds = array<i64: 1, 8, 128>}, {transform_indices = @transform_5, window_bounds = array<i64: 1, 1, 2, 128>}]} {
    %c8_i32 = arith.constant 8 : i32
    %0 = arith.muli %arg1, %c8_i32 : i32
    %c0 = arith.constant 0 : index
    %c0_0 = arith.constant 0 : index
    %c0_1 = arith.constant 0 : index
    %1 = vector.load %arg2[%c0, %c0_0, %c0_1] : memref<1x8x32xf32, #tpu.memory_space<vmem>>, vector<1x8x32xf32>
    %2 = vector.shape_cast %1 : vector<1x8x32xf32> to vector<8x32xf32>
    %c0_2 = arith.constant 0 : index
    %c0_3 = arith.constant 0 : index
    %c0_4 = arith.constant 0 : index
    %3 = vector.load %arg3[%c0_2, %c0_3, %c0_4] : memref<1x8x32xf32, #tpu.memory_space<vmem>>, vector<1x8x32xf32>
    %4 = vector.shape_cast %3 : vector<1x8x32xf32> to vector<8x32xf32>
    %c0_5 = arith.constant 0 : index
    %c0_6 = arith.constant 0 : index
    %c0_7 = arith.constant 0 : index
    %5 = vector.load %arg4[%c0_5, %c0_6, %c0_7] : memref<1x8x32xf32, #tpu.memory_space<vmem>>, vector<1x8x32xf32>
    %6 = vector.shape_cast %5 : vector<1x8x32xf32> to vector<8x32xf32>
    %7 = tpu.concatenate %2, %4, %6 in 0 : vector<8x32xf32>, vector<8x32xf32>, vector<8x32xf32> -> vector<24x32xf32>
    %c8_i32_8 = arith.constant 8 : i32
    %8 = arith.subi %0, %c8_i32_8 : i32
    %9 = tpu.iota {dimensions = array<i32: 0>} : vector<24x1xi32>
    %10 = vector.broadcast %8 : i32 to vector<24x1xi32>
    %11 = arith.addi %10, %9 : vector<24x1xi32>
    %c0_i32 = arith.constant 0 : i32
    %12 = vector.broadcast %c0_i32 : i32 to vector<24x1xi32>
    %13 = arith.cmpi sge, %11, %12 : vector<24x1xi32>
    %c8_i32_9 = arith.constant 8 : i32
    %14 = vector.broadcast %c8_i32_9 : i32 to vector<24x1xi32>
    %15 = arith.cmpi slt, %11, %14 : vector<24x1xi32>
    %16 = arith.andi %13, %15 : vector<24x1xi1>
    %cst = arith.constant 0.000000e+00 : f32
    %17 = vector.shape_cast %16 : vector<24x1xi1> to vector<24x1xi1>
    %18 = vector.broadcast %17 : vector<24x1xi1> to vector<24x32xi1>
    %19 = vector.broadcast %cst : f32 to vector<24x32xf32>
    %20 = arith.select %18, %7, %19 : vector<24x32xi1>, vector<24x32xf32>
    %21 = vector.extract_strided_slice %20 {offsets = [7, 0], sizes = [8, 32], strides = [1, 1]} : vector<24x32xf32> to vector<8x32xf32>
    %22 = vector.extract_strided_slice %20 {offsets = [8, 0], sizes = [8, 32], strides = [1, 1]} : vector<24x32xf32> to vector<8x32xf32>
    %23 = vector.extract_strided_slice %20 {offsets = [9, 0], sizes = [8, 32], strides = [1, 1]} : vector<24x32xf32> to vector<8x32xf32>
    %24 = vector.extract_strided_slice %20 {offsets = [10, 0], sizes = [8, 32], strides = [1, 1]} : vector<24x32xf32> to vector<8x32xf32>
    %25 = tpu.concatenate %21, %22, %23, %24 in 1 : vector<8x32xf32>, vector<8x32xf32>, vector<8x32xf32>, vector<8x32xf32> -> vector<8x128xf32>
    %26 = arith.truncf %25 : vector<8x128xf32> to vector<8x128xbf16>
    %c0_10 = arith.constant 0 : index
    %c0_11 = arith.constant 0 : index
    %27 = vector.load %arg5[%c0_10, %c0_11] : memref<128x128xbf16, #tpu.memory_space<vmem>>, vector<128x128xbf16>
    %cst_12 = arith.constant dense<0.000000e+00> : vector<8x128xf32>
    %28 = tpu.matmul %26, %27, %cst_12 {dimension_numbers = #tpu.dot_dimension_numbers<[1], [0], [0], [1], [0, 0, 1, 1], [], []>} : vector<8x128xbf16>, vector<128x128xbf16>, vector<8x128xf32> -> vector<8x128xf32>
    %c0_13 = arith.constant 0 : index
    %c0_14 = arith.constant 0 : index
    %c0_15 = arith.constant 0 : index
    %29 = vector.load %arg6[%c0_13, %c0_14, %c0_15] : memref<1x8x128xf32, #tpu.memory_space<vmem>>, vector<1x8x128xf32>
    %30 = vector.shape_cast %29 : vector<1x8x128xf32> to vector<8x128xf32>
    %31 = vector.shape_cast %28 : vector<8x128xf32> to vector<1x8x128xf32>
    tpu.vector_store %arg6[%c0_13, %c0_14, %c0_15], %31 {strides = array<i32>} : memref<1x8x128xf32, #tpu.memory_space<vmem>>, vector<1x8x128xf32>,
    %32 = tpu.iota {dimensions = array<i32: 0>} : vector<8x1xi32>
    %33 = vector.broadcast %0 : i32 to vector<8x1xi32>
    %34 = arith.addi %33, %32 : vector<8x1xi32>
    %c8_i32_16 = arith.constant 8 : i32
    %35 = vector.broadcast %c8_i32_16 : i32 to vector<8x1xi32>
    %36 = arith.cmpi slt, %34, %35 : vector<8x1xi32>
    %cst_17 = arith.constant 0.000000e+00 : f32
    %37 = vector.shape_cast %36 : vector<8x1xi1> to vector<8x1xi1>
    %38 = vector.broadcast %37 : vector<8x1xi1> to vector<8x128xi1>
    %39 = vector.broadcast %cst_17 : f32 to vector<8x128xf32>
    %40 = arith.select %38, %28, %39 : vector<8x128xi1>, vector<8x128xf32>
    %cst_18 = arith.constant dense<0.000000e+00> : vector<128xf32>
    %41 = vector.multi_reduction <add>, %40, %cst_18 [0] : vector<8x128xf32> to vector<128xf32>
    %42 = vector.shape_cast %41 : vector<128xf32> to vector<1x128xf32>
    %43 = arith.mulf %40, %40 : vector<8x128xf32>
    %cst_19 = arith.constant dense<0.000000e+00> : vector<128xf32>
    %44 = vector.multi_reduction <add>, %43, %cst_19 [0] : vector<8x128xf32> to vector<128xf32>
    %45 = vector.shape_cast %44 : vector<128xf32> to vector<1x128xf32>
    %46 = tpu.concatenate %42, %45 in 0 : vector<1x128xf32>, vector<1x128xf32> -> vector<2x128xf32>
    %c0_20 = arith.constant 0 : index
    %c0_21 = arith.constant 0 : index
    %c0_22 = arith.constant 0 : index
    %c0_23 = arith.constant 0 : index
    %47 = vector.load %arg7[%c0_20, %c0_21, %c0_22, %c0_23] : memref<1x1x2x128xf32, #tpu.memory_space<vmem>>, vector<1x1x2x128xf32>
    %48 = vector.shape_cast %47 : vector<1x1x2x128xf32> to vector<2x128xf32>
    %49 = vector.shape_cast %46 : vector<2x128xf32> to vector<1x1x2x128xf32>
    tpu.vector_store %arg7[%c0_20, %c0_21, %c0_22, %c0_23], %49 {strides = array<i32>} : memref<1x1x2x128xf32, #tpu.memory_space<vmem>>, vector<1x1x2x128xf32>,
    return
  }
  func.func @transform_0(%arg0: i32, %arg1: i32) -> (i32, i32, i32) {
    %c1_i32 = arith.constant 1 : i32
    %0 = arith.muli %arg1, %c1_i32 : i32
    %c1_i32_0 = arith.constant 1 : i32
    %1 = arith.subi %0, %c1_i32_0 : i32
    %c0_i32 = arith.constant 0 : i32
    %2 = arith.maxsi %1, %c0_i32 : i32
    %c0_i32_1 = arith.constant 0 : i32
    %c0_i32_2 = arith.constant 0 : i32
    return %arg0, %2, %c0_i32_1 : i32, i32, i32
  }
  func.func @transform_1(%arg0: i32, %arg1: i32) -> (i32, i32, i32) {
    %c0_i32 = arith.constant 0 : i32
    %c0_i32_0 = arith.constant 0 : i32
    return %arg0, %arg1, %c0_i32 : i32, i32, i32
  }
  func.func @transform_2(%arg0: i32, %arg1: i32) -> (i32, i32, i32) {
    %c1_i32 = arith.constant 1 : i32
    %0 = arith.addi %arg1, %c1_i32 : i32
    %c1_i32_0 = arith.constant 1 : i32
    %1 = arith.muli %0, %c1_i32_0 : i32
    %c0_i32 = arith.constant 0 : i32
    %2 = arith.minsi %1, %c0_i32 : i32
    %c0_i32_1 = arith.constant 0 : i32
    %c0_i32_2 = arith.constant 0 : i32
    return %arg0, %2, %c0_i32_1 : i32, i32, i32
  }
  func.func @transform_3(%arg0: i32, %arg1: i32) -> (i32, i32) {
    %c0_i32 = arith.constant 0 : i32
    %c0_i32_0 = arith.constant 0 : i32
    %c0_i32_1 = arith.constant 0 : i32
    return %c0_i32, %c0_i32_0 : i32, i32
  }
  func.func @transform_4(%arg0: i32, %arg1: i32) -> (i32, i32, i32) {
    %c0_i32 = arith.constant 0 : i32
    %c0_i32_0 = arith.constant 0 : i32
    return %arg0, %arg1, %c0_i32 : i32, i32, i32
  }
  func.func @transform_5(%arg0: i32, %arg1: i32) -> (i32, i32, i32, i32) {
    %c0_i32 = arith.constant 0 : i32
    %c0_i32_0 = arith.constant 0 : i32
    %c0_i32_1 = arith.constant 0 : i32
    return %arg0, %arg1, %c0_i32, %c0_i32_0 : i32, i32, i32, i32
  }
}

module attributes {stable_mosaic.version = 11 : i64} {
  func.func @_proj_kernel(%arg0: i32, %arg1: i32, %arg2: memref<1x8x128xf32, #tpu.memory_space<vmem>>, %arg3: memref<1x8x128xf32, #tpu.memory_space<vmem>>, %arg4: memref<1x8x128xf32, #tpu.memory_space<vmem>>, %arg5: memref<1x128xf32, #tpu.memory_space<vmem>>, %arg6: memref<1x128xf32, #tpu.memory_space<vmem>>, %arg7: memref<384x32xbf16, #tpu.memory_space<vmem>>, %arg8: memref<1x8x32xf32, #tpu.memory_space<vmem>>, %arg9: memref<1x1x2x32xf32, #tpu.memory_space<vmem>>) attributes {dimension_semantics = [#tpu.dimension_semantics<parallel>, #tpu.dimension_semantics<parallel>], iteration_bounds = array<i64: 2, 1>, scalar_prefetch = 0 : i64, scratch_operands = 0 : i64, tpu.core_type = #tpu.core_type<tc>, window_params = [{transform_indices = @transform_0, window_bounds = array<i64: 1, 8, 128>}, {transform_indices = @transform_1, window_bounds = array<i64: 1, 8, 128>}, {transform_indices = @transform_2, window_bounds = array<i64: 1, 8, 128>}, {pipeline_mode = #tpu.pipeline_mode<synchronous>, transform_indices = @transform_3, window_bounds = array<i64: 1, 128>}, {pipeline_mode = #tpu.pipeline_mode<synchronous>, transform_indices = @transform_4, window_bounds = array<i64: 1, 128>}, {pipeline_mode = #tpu.pipeline_mode<synchronous>, transform_indices = @transform_5, window_bounds = array<i64: 384, 32>}, {transform_indices = @transform_6, window_bounds = array<i64: 1, 8, 32>}, {transform_indices = @transform_7, window_bounds = array<i64: 1, 1, 2, 32>}]} {
    %c8_i32 = arith.constant 8 : i32
    %0 = arith.muli %arg1, %c8_i32 : i32
    %c0 = arith.constant 0 : index
    %c0_0 = arith.constant 0 : index
    %c0_1 = arith.constant 0 : index
    %1 = vector.load %arg2[%c0, %c0_0, %c0_1] : memref<1x8x128xf32, #tpu.memory_space<vmem>>, vector<1x8x128xf32>
    %2 = vector.shape_cast %1 : vector<1x8x128xf32> to vector<8x128xf32>
    %c0_2 = arith.constant 0 : index
    %c0_3 = arith.constant 0 : index
    %c0_4 = arith.constant 0 : index
    %3 = vector.load %arg3[%c0_2, %c0_3, %c0_4] : memref<1x8x128xf32, #tpu.memory_space<vmem>>, vector<1x8x128xf32>
    %4 = vector.shape_cast %3 : vector<1x8x128xf32> to vector<8x128xf32>
    %c0_5 = arith.constant 0 : index
    %c0_6 = arith.constant 0 : index
    %c0_7 = arith.constant 0 : index
    %5 = vector.load %arg4[%c0_5, %c0_6, %c0_7] : memref<1x8x128xf32, #tpu.memory_space<vmem>>, vector<1x8x128xf32>
    %6 = vector.shape_cast %5 : vector<1x8x128xf32> to vector<8x128xf32>
    %7 = tpu.concatenate %2, %4, %6 in 0 : vector<8x128xf32>, vector<8x128xf32>, vector<8x128xf32> -> vector<24x128xf32>
    %c8_i32_8 = arith.constant 8 : i32
    %8 = arith.subi %0, %c8_i32_8 : i32
    %9 = tpu.iota {dimensions = array<i32: 0>} : vector<24x1xi32>
    %10 = vector.broadcast %8 : i32 to vector<24x1xi32>
    %11 = arith.addi %10, %9 : vector<24x1xi32>
    %c0_i32 = arith.constant 0 : i32
    %12 = vector.broadcast %c0_i32 : i32 to vector<24x1xi32>
    %13 = arith.cmpi sge, %11, %12 : vector<24x1xi32>
    %c8_i32_9 = arith.constant 8 : i32
    %14 = vector.broadcast %c8_i32_9 : i32 to vector<24x1xi32>
    %15 = arith.cmpi slt, %11, %14 : vector<24x1xi32>
    %16 = arith.andi %13, %15 : vector<24x1xi1>
    %c0_10 = arith.constant 0 : index
    %c0_11 = arith.constant 0 : index
    %17 = vector.load %arg5[%c0_10, %c0_11] : memref<1x128xf32, #tpu.memory_space<vmem>>, vector<1x128xf32>
    %18 = vector.broadcast %17 : vector<1x128xf32> to vector<24x128xf32>
    %19 = arith.mulf %7, %18 : vector<24x128xf32>
    %c0_12 = arith.constant 0 : index
    %c0_13 = arith.constant 0 : index
    %20 = vector.load %arg6[%c0_12, %c0_13] : memref<1x128xf32, #tpu.memory_space<vmem>>, vector<1x128xf32>
    %21 = vector.broadcast %20 : vector<1x128xf32> to vector<24x128xf32>
    %22 = arith.addf %19, %21 : vector<24x128xf32>
    %cst = arith.constant 0.000000e+00 : f32
    %23 = vector.broadcast %cst : f32 to vector<24x128xf32>
    %24 = arith.maximumf %22, %23 : vector<24x128xf32>
    %cst_14 = arith.constant 0.000000e+00 : f32
    %25 = vector.shape_cast %16 : vector<24x1xi1> to vector<24x1xi1>
    %26 = vector.broadcast %25 : vector<24x1xi1> to vector<24x128xi1>
    %27 = vector.broadcast %cst_14 : f32 to vector<24x128xf32>
    %28 = arith.select %26, %24, %27 : vector<24x128xi1>, vector<24x128xf32>
    %29 = vector.extract_strided_slice %28 {offsets = [7, 0], sizes = [10, 128], strides = [1, 1]} : vector<24x128xf32> to vector<10x128xf32>
    %30 = vector.extract_strided_slice %28 {offsets = [8, 0], sizes = [10, 128], strides = [1, 1]} : vector<24x128xf32> to vector<10x128xf32>
    %31 = arith.maximumf %29, %30 : vector<10x128xf32>
    %32 = vector.extract_strided_slice %16 {offsets = [7, 0], sizes = [10, 1], strides = [1, 1]} : vector<24x1xi1> to vector<10x1xi1>
    %cst_15 = arith.constant 0.000000e+00 : f32
    %33 = vector.shape_cast %32 : vector<10x1xi1> to vector<10x1xi1>
    %34 = vector.broadcast %33 : vector<10x1xi1> to vector<10x128xi1>
    %35 = vector.broadcast %cst_15 : f32 to vector<10x128xf32>
    %36 = arith.select %34, %31, %35 : vector<10x128xi1>, vector<10x128xf32>
    %37 = vector.extract_strided_slice %36 {offsets = [0, 0], sizes = [8, 128], strides = [1, 1]} : vector<10x128xf32> to vector<8x128xf32>
    %38 = vector.extract_strided_slice %36 {offsets = [1, 0], sizes = [8, 128], strides = [1, 1]} : vector<10x128xf32> to vector<8x128xf32>
    %39 = vector.extract_strided_slice %36 {offsets = [2, 0], sizes = [8, 128], strides = [1, 1]} : vector<10x128xf32> to vector<8x128xf32>
    %40 = tpu.concatenate %37, %38, %39 in 1 : vector<8x128xf32>, vector<8x128xf32>, vector<8x128xf32> -> vector<8x384xf32>
    %41 = arith.truncf %40 : vector<8x384xf32> to vector<8x384xbf16>
    %c0_16 = arith.constant 0 : index
    %c0_17 = arith.constant 0 : index
    %42 = vector.load %arg7[%c0_16, %c0_17] : memref<384x32xbf16, #tpu.memory_space<vmem>>, vector<384x32xbf16>
    %cst_18 = arith.constant dense<0.000000e+00> : vector<8x32xf32>
    %43 = tpu.matmul %41, %42, %cst_18 {dimension_numbers = #tpu.dot_dimension_numbers<[1], [0], [0], [1], [0, 0, 1, 1], [], []>} : vector<8x384xbf16>, vector<384x32xbf16>, vector<8x32xf32> -> vector<8x32xf32>
    %c0_19 = arith.constant 0 : index
    %c0_20 = arith.constant 0 : index
    %c0_21 = arith.constant 0 : index
    %44 = vector.load %arg8[%c0_19, %c0_20, %c0_21] : memref<1x8x32xf32, #tpu.memory_space<vmem>>, vector<1x8x32xf32>
    %45 = vector.shape_cast %44 : vector<1x8x32xf32> to vector<8x32xf32>
    %46 = vector.shape_cast %43 : vector<8x32xf32> to vector<1x8x32xf32>
    tpu.vector_store %arg8[%c0_19, %c0_20, %c0_21], %46 {strides = array<i32>} : memref<1x8x32xf32, #tpu.memory_space<vmem>>, vector<1x8x32xf32>,
    %47 = tpu.iota {dimensions = array<i32: 0>} : vector<8x1xi32>
    %48 = vector.broadcast %0 : i32 to vector<8x1xi32>
    %49 = arith.addi %48, %47 : vector<8x1xi32>
    %c8_i32_22 = arith.constant 8 : i32
    %50 = vector.broadcast %c8_i32_22 : i32 to vector<8x1xi32>
    %51 = arith.cmpi slt, %49, %50 : vector<8x1xi32>
    %cst_23 = arith.constant 0.000000e+00 : f32
    %52 = vector.shape_cast %51 : vector<8x1xi1> to vector<8x1xi1>
    %53 = vector.broadcast %52 : vector<8x1xi1> to vector<8x32xi1>
    %54 = vector.broadcast %cst_23 : f32 to vector<8x32xf32>
    %55 = arith.select %53, %43, %54 : vector<8x32xi1>, vector<8x32xf32>
    %cst_24 = arith.constant dense<0.000000e+00> : vector<32xf32>
    %56 = vector.multi_reduction <add>, %55, %cst_24 [0] : vector<8x32xf32> to vector<32xf32>
    %57 = vector.shape_cast %56 : vector<32xf32> to vector<1x32xf32>
    %58 = arith.mulf %55, %55 : vector<8x32xf32>
    %cst_25 = arith.constant dense<0.000000e+00> : vector<32xf32>
    %59 = vector.multi_reduction <add>, %58, %cst_25 [0] : vector<8x32xf32> to vector<32xf32>
    %60 = vector.shape_cast %59 : vector<32xf32> to vector<1x32xf32>
    %61 = tpu.concatenate %57, %60 in 0 : vector<1x32xf32>, vector<1x32xf32> -> vector<2x32xf32>
    %c0_26 = arith.constant 0 : index
    %c0_27 = arith.constant 0 : index
    %c0_28 = arith.constant 0 : index
    %c0_29 = arith.constant 0 : index
    %62 = vector.load %arg9[%c0_26, %c0_27, %c0_28, %c0_29] : memref<1x1x2x32xf32, #tpu.memory_space<vmem>>, vector<1x1x2x32xf32>
    %63 = vector.shape_cast %62 : vector<1x1x2x32xf32> to vector<2x32xf32>
    %64 = vector.shape_cast %61 : vector<2x32xf32> to vector<1x1x2x32xf32>
    tpu.vector_store %arg9[%c0_26, %c0_27, %c0_28, %c0_29], %64 {strides = array<i32>} : memref<1x1x2x32xf32, #tpu.memory_space<vmem>>, vector<1x1x2x32xf32>,
    return
  }
  func.func @transform_0(%arg0: i32, %arg1: i32) -> (i32, i32, i32) {
    %c1_i32 = arith.constant 1 : i32
    %0 = arith.muli %arg1, %c1_i32 : i32
    %c1_i32_0 = arith.constant 1 : i32
    %1 = arith.subi %0, %c1_i32_0 : i32
    %c0_i32 = arith.constant 0 : i32
    %2 = arith.maxsi %1, %c0_i32 : i32
    %c0_i32_1 = arith.constant 0 : i32
    %c0_i32_2 = arith.constant 0 : i32
    return %arg0, %2, %c0_i32_1 : i32, i32, i32
  }
  func.func @transform_1(%arg0: i32, %arg1: i32) -> (i32, i32, i32) {
    %c0_i32 = arith.constant 0 : i32
    %c0_i32_0 = arith.constant 0 : i32
    return %arg0, %arg1, %c0_i32 : i32, i32, i32
  }
  func.func @transform_2(%arg0: i32, %arg1: i32) -> (i32, i32, i32) {
    %c1_i32 = arith.constant 1 : i32
    %0 = arith.addi %arg1, %c1_i32 : i32
    %c1_i32_0 = arith.constant 1 : i32
    %1 = arith.muli %0, %c1_i32_0 : i32
    %c0_i32 = arith.constant 0 : i32
    %2 = arith.minsi %1, %c0_i32 : i32
    %c0_i32_1 = arith.constant 0 : i32
    %c0_i32_2 = arith.constant 0 : i32
    return %arg0, %2, %c0_i32_1 : i32, i32, i32
  }
  func.func @transform_3(%arg0: i32, %arg1: i32) -> (i32, i32) {
    %c0_i32 = arith.constant 0 : i32
    %c0_i32_0 = arith.constant 0 : i32
    %c0_i32_1 = arith.constant 0 : i32
    return %c0_i32, %c0_i32_0 : i32, i32
  }
  func.func @transform_4(%arg0: i32, %arg1: i32) -> (i32, i32) {
    %c0_i32 = arith.constant 0 : i32
    %c0_i32_0 = arith.constant 0 : i32
    %c0_i32_1 = arith.constant 0 : i32
    return %c0_i32, %c0_i32_0 : i32, i32
  }
  func.func @transform_5(%arg0: i32, %arg1: i32) -> (i32, i32) {
    %c0_i32 = arith.constant 0 : i32
    %c0_i32_0 = arith.constant 0 : i32
    %c0_i32_1 = arith.constant 0 : i32
    return %c0_i32, %c0_i32_0 : i32, i32
  }
  func.func @transform_6(%arg0: i32, %arg1: i32) -> (i32, i32, i32) {
    %c0_i32 = arith.constant 0 : i32
    %c0_i32_0 = arith.constant 0 : i32
    return %arg0, %arg1, %c0_i32 : i32, i32, i32
  }
  func.func @transform_7(%arg0: i32, %arg1: i32) -> (i32, i32, i32, i32) {
    %c0_i32 = arith.constant 0 : i32
    %c0_i32_0 = arith.constant 0 : i32
    %c0_i32_1 = arith.constant 0 : i32
    return %arg0, %arg1, %c0_i32, %c0_i32_0 : i32, i32, i32, i32
  }
}

module attributes {stable_mosaic.version = 11 : i64} {
  func.func @_proj_kernel(%arg0: i32, %arg1: i32, %arg2: memref<1x8x32xf32, #tpu.memory_space<vmem>>, %arg3: memref<1x8x32xf32, #tpu.memory_space<vmem>>, %arg4: memref<1x8x32xf32, #tpu.memory_space<vmem>>, %arg5: memref<1x32xf32, #tpu.memory_space<vmem>>, %arg6: memref<1x32xf32, #tpu.memory_space<vmem>>, %arg7: memref<96x32xbf16, #tpu.memory_space<vmem>>, %arg8: memref<1x8x32xf32, #tpu.memory_space<vmem>>, %arg9: memref<1x1x2x32xf32, #tpu.memory_space<vmem>>) attributes {dimension_semantics = [#tpu.dimension_semantics<parallel>, #tpu.dimension_semantics<parallel>], iteration_bounds = array<i64: 2, 1>, scalar_prefetch = 0 : i64, scratch_operands = 0 : i64, tpu.core_type = #tpu.core_type<tc>, window_params = [{transform_indices = @transform_0, window_bounds = array<i64: 1, 8, 32>}, {transform_indices = @transform_1, window_bounds = array<i64: 1, 8, 32>}, {transform_indices = @transform_2, window_bounds = array<i64: 1, 8, 32>}, {pipeline_mode = #tpu.pipeline_mode<synchronous>, transform_indices = @transform_3, window_bounds = array<i64: 1, 32>}, {pipeline_mode = #tpu.pipeline_mode<synchronous>, transform_indices = @transform_4, window_bounds = array<i64: 1, 32>}, {pipeline_mode = #tpu.pipeline_mode<synchronous>, transform_indices = @transform_5, window_bounds = array<i64: 96, 32>}, {transform_indices = @transform_6, window_bounds = array<i64: 1, 8, 32>}, {transform_indices = @transform_7, window_bounds = array<i64: 1, 1, 2, 32>}]} {
    %c8_i32 = arith.constant 8 : i32
    %0 = arith.muli %arg1, %c8_i32 : i32
    %c0 = arith.constant 0 : index
    %c0_0 = arith.constant 0 : index
    %c0_1 = arith.constant 0 : index
    %1 = vector.load %arg2[%c0, %c0_0, %c0_1] : memref<1x8x32xf32, #tpu.memory_space<vmem>>, vector<1x8x32xf32>
    %2 = vector.shape_cast %1 : vector<1x8x32xf32> to vector<8x32xf32>
    %c0_2 = arith.constant 0 : index
    %c0_3 = arith.constant 0 : index
    %c0_4 = arith.constant 0 : index
    %3 = vector.load %arg3[%c0_2, %c0_3, %c0_4] : memref<1x8x32xf32, #tpu.memory_space<vmem>>, vector<1x8x32xf32>
    %4 = vector.shape_cast %3 : vector<1x8x32xf32> to vector<8x32xf32>
    %c0_5 = arith.constant 0 : index
    %c0_6 = arith.constant 0 : index
    %c0_7 = arith.constant 0 : index
    %5 = vector.load %arg4[%c0_5, %c0_6, %c0_7] : memref<1x8x32xf32, #tpu.memory_space<vmem>>, vector<1x8x32xf32>
    %6 = vector.shape_cast %5 : vector<1x8x32xf32> to vector<8x32xf32>
    %7 = tpu.concatenate %2, %4, %6 in 0 : vector<8x32xf32>, vector<8x32xf32>, vector<8x32xf32> -> vector<24x32xf32>
    %c8_i32_8 = arith.constant 8 : i32
    %8 = arith.subi %0, %c8_i32_8 : i32
    %9 = tpu.iota {dimensions = array<i32: 0>} : vector<24x1xi32>
    %10 = vector.broadcast %8 : i32 to vector<24x1xi32>
    %11 = arith.addi %10, %9 : vector<24x1xi32>
    %c0_i32 = arith.constant 0 : i32
    %12 = vector.broadcast %c0_i32 : i32 to vector<24x1xi32>
    %13 = arith.cmpi sge, %11, %12 : vector<24x1xi32>
    %c8_i32_9 = arith.constant 8 : i32
    %14 = vector.broadcast %c8_i32_9 : i32 to vector<24x1xi32>
    %15 = arith.cmpi slt, %11, %14 : vector<24x1xi32>
    %16 = arith.andi %13, %15 : vector<24x1xi1>
    %c0_10 = arith.constant 0 : index
    %c0_11 = arith.constant 0 : index
    %17 = vector.load %arg5[%c0_10, %c0_11] : memref<1x32xf32, #tpu.memory_space<vmem>>, vector<1x32xf32>
    %18 = vector.broadcast %17 : vector<1x32xf32> to vector<24x32xf32>
    %19 = arith.mulf %7, %18 : vector<24x32xf32>
    %c0_12 = arith.constant 0 : index
    %c0_13 = arith.constant 0 : index
    %20 = vector.load %arg6[%c0_12, %c0_13] : memref<1x32xf32, #tpu.memory_space<vmem>>, vector<1x32xf32>
    %21 = vector.broadcast %20 : vector<1x32xf32> to vector<24x32xf32>
    %22 = arith.addf %19, %21 : vector<24x32xf32>
    %cst = arith.constant 0.000000e+00 : f32
    %23 = vector.broadcast %cst : f32 to vector<24x32xf32>
    %24 = arith.maximumf %22, %23 : vector<24x32xf32>
    %cst_14 = arith.constant 0.000000e+00 : f32
    %25 = vector.shape_cast %16 : vector<24x1xi1> to vector<24x1xi1>
    %26 = vector.broadcast %25 : vector<24x1xi1> to vector<24x32xi1>
    %27 = vector.broadcast %cst_14 : f32 to vector<24x32xf32>
    %28 = arith.select %26, %24, %27 : vector<24x32xi1>, vector<24x32xf32>
    %29 = vector.extract_strided_slice %28 {offsets = [7, 0], sizes = [10, 32], strides = [1, 1]} : vector<24x32xf32> to vector<10x32xf32>
    %30 = vector.extract_strided_slice %29 {offsets = [0, 0], sizes = [8, 32], strides = [1, 1]} : vector<10x32xf32> to vector<8x32xf32>
    %31 = vector.extract_strided_slice %29 {offsets = [1, 0], sizes = [8, 32], strides = [1, 1]} : vector<10x32xf32> to vector<8x32xf32>
    %32 = vector.extract_strided_slice %29 {offsets = [2, 0], sizes = [8, 32], strides = [1, 1]} : vector<10x32xf32> to vector<8x32xf32>
    %33 = tpu.concatenate %30, %31, %32 in 1 : vector<8x32xf32>, vector<8x32xf32>, vector<8x32xf32> -> vector<8x96xf32>
    %34 = arith.truncf %33 : vector<8x96xf32> to vector<8x96xbf16>
    %c0_15 = arith.constant 0 : index
    %c0_16 = arith.constant 0 : index
    %35 = vector.load %arg7[%c0_15, %c0_16] : memref<96x32xbf16, #tpu.memory_space<vmem>>, vector<96x32xbf16>
    %cst_17 = arith.constant dense<0.000000e+00> : vector<8x32xf32>
    %36 = tpu.matmul %34, %35, %cst_17 {dimension_numbers = #tpu.dot_dimension_numbers<[1], [0], [0], [1], [0, 0, 1, 1], [], []>} : vector<8x96xbf16>, vector<96x32xbf16>, vector<8x32xf32> -> vector<8x32xf32>
    %c0_18 = arith.constant 0 : index
    %c0_19 = arith.constant 0 : index
    %c0_20 = arith.constant 0 : index
    %37 = vector.load %arg8[%c0_18, %c0_19, %c0_20] : memref<1x8x32xf32, #tpu.memory_space<vmem>>, vector<1x8x32xf32>
    %38 = vector.shape_cast %37 : vector<1x8x32xf32> to vector<8x32xf32>
    %39 = vector.shape_cast %36 : vector<8x32xf32> to vector<1x8x32xf32>
    tpu.vector_store %arg8[%c0_18, %c0_19, %c0_20], %39 {strides = array<i32>} : memref<1x8x32xf32, #tpu.memory_space<vmem>>, vector<1x8x32xf32>,
    %40 = tpu.iota {dimensions = array<i32: 0>} : vector<8x1xi32>
    %41 = vector.broadcast %0 : i32 to vector<8x1xi32>
    %42 = arith.addi %41, %40 : vector<8x1xi32>
    %c8_i32_21 = arith.constant 8 : i32
    %43 = vector.broadcast %c8_i32_21 : i32 to vector<8x1xi32>
    %44 = arith.cmpi slt, %42, %43 : vector<8x1xi32>
    %cst_22 = arith.constant 0.000000e+00 : f32
    %45 = vector.shape_cast %44 : vector<8x1xi1> to vector<8x1xi1>
    %46 = vector.broadcast %45 : vector<8x1xi1> to vector<8x32xi1>
    %47 = vector.broadcast %cst_22 : f32 to vector<8x32xf32>
    %48 = arith.select %46, %36, %47 : vector<8x32xi1>, vector<8x32xf32>
    %cst_23 = arith.constant dense<0.000000e+00> : vector<32xf32>
    %49 = vector.multi_reduction <add>, %48, %cst_23 [0] : vector<8x32xf32> to vector<32xf32>
    %50 = vector.shape_cast %49 : vector<32xf32> to vector<1x32xf32>
    %51 = arith.mulf %48, %48 : vector<8x32xf32>
    %cst_24 = arith.constant dense<0.000000e+00> : vector<32xf32>
    %52 = vector.multi_reduction <add>, %51, %cst_24 [0] : vector<8x32xf32> to vector<32xf32>
    %53 = vector.shape_cast %52 : vector<32xf32> to vector<1x32xf32>
    %54 = tpu.concatenate %50, %53 in 0 : vector<1x32xf32>, vector<1x32xf32> -> vector<2x32xf32>
    %c0_25 = arith.constant 0 : index
    %c0_26 = arith.constant 0 : index
    %c0_27 = arith.constant 0 : index
    %c0_28 = arith.constant 0 : index
    %55 = vector.load %arg9[%c0_25, %c0_26, %c0_27, %c0_28] : memref<1x1x2x32xf32, #tpu.memory_space<vmem>>, vector<1x1x2x32xf32>
    %56 = vector.shape_cast %55 : vector<1x1x2x32xf32> to vector<2x32xf32>
    %57 = vector.shape_cast %54 : vector<2x32xf32> to vector<1x1x2x32xf32>
    tpu.vector_store %arg9[%c0_25, %c0_26, %c0_27, %c0_28], %57 {strides = array<i32>} : memref<1x1x2x32xf32, #tpu.memory_space<vmem>>, vector<1x1x2x32xf32>,
    return
  }
  func.func @transform_0(%arg0: i32, %arg1: i32) -> (i32, i32, i32) {
    %c1_i32 = arith.constant 1 : i32
    %0 = arith.muli %arg1, %c1_i32 : i32
    %c1_i32_0 = arith.constant 1 : i32
    %1 = arith.subi %0, %c1_i32_0 : i32
    %c0_i32 = arith.constant 0 : i32
    %2 = arith.maxsi %1, %c0_i32 : i32
    %c0_i32_1 = arith.constant 0 : i32
    %c0_i32_2 = arith.constant 0 : i32
    return %arg0, %2, %c0_i32_1 : i32, i32, i32
  }
  func.func @transform_1(%arg0: i32, %arg1: i32) -> (i32, i32, i32) {
    %c0_i32 = arith.constant 0 : i32
    %c0_i32_0 = arith.constant 0 : i32
    return %arg0, %arg1, %c0_i32 : i32, i32, i32
  }
  func.func @transform_2(%arg0: i32, %arg1: i32) -> (i32, i32, i32) {
    %c1_i32 = arith.constant 1 : i32
    %0 = arith.addi %arg1, %c1_i32 : i32
    %c1_i32_0 = arith.constant 1 : i32
    %1 = arith.muli %0, %c1_i32_0 : i32
    %c0_i32 = arith.constant 0 : i32
    %2 = arith.minsi %1, %c0_i32 : i32
    %c0_i32_1 = arith.constant 0 : i32
    %c0_i32_2 = arith.constant 0 : i32
    return %arg0, %2, %c0_i32_1 : i32, i32, i32
  }
  func.func @transform_3(%arg0: i32, %arg1: i32) -> (i32, i32) {
    %c0_i32 = arith.constant 0 : i32
    %c0_i32_0 = arith.constant 0 : i32
    %c0_i32_1 = arith.constant 0 : i32
    return %c0_i32, %c0_i32_0 : i32, i32
  }
  func.func @transform_4(%arg0: i32, %arg1: i32) -> (i32, i32) {
    %c0_i32 = arith.constant 0 : i32
    %c0_i32_0 = arith.constant 0 : i32
    %c0_i32_1 = arith.constant 0 : i32
    return %c0_i32, %c0_i32_0 : i32, i32
  }
  func.func @transform_5(%arg0: i32, %arg1: i32) -> (i32, i32) {
    %c0_i32 = arith.constant 0 : i32
    %c0_i32_0 = arith.constant 0 : i32
    %c0_i32_1 = arith.constant 0 : i32
    return %c0_i32, %c0_i32_0 : i32, i32
  }
  func.func @transform_6(%arg0: i32, %arg1: i32) -> (i32, i32, i32) {
    %c0_i32 = arith.constant 0 : i32
    %c0_i32_0 = arith.constant 0 : i32
    return %arg0, %arg1, %c0_i32 : i32, i32, i32
  }
  func.func @transform_7(%arg0: i32, %arg1: i32) -> (i32, i32, i32, i32) {
    %c0_i32 = arith.constant 0 : i32
    %c0_i32_0 = arith.constant 0 : i32
    %c0_i32_1 = arith.constant 0 : i32
    return %arg0, %arg1, %c0_i32, %c0_i32_0 : i32, i32, i32, i32
  }
}

module attributes {stable_mosaic.version = 11 : i64} {
  func.func @_tail_kernel(%arg0: i32, %arg1: i32, %arg2: memref<1x8x32xf32, #tpu.memory_space<vmem>>, %arg3: memref<1x8x32xf32, #tpu.memory_space<vmem>>, %arg4: memref<1x32xf32, #tpu.memory_space<vmem>>, %arg5: memref<1x32xf32, #tpu.memory_space<vmem>>, %arg6: memref<32x192xbf16, #tpu.memory_space<vmem>>, %arg7: memref<1x192xf32, #tpu.memory_space<vmem>>, %arg8: memref<32x64xbf16, #tpu.memory_space<vmem>>, %arg9: memref<1x64xf32, #tpu.memory_space<vmem>>, %arg10: memref<32x64xbf16, #tpu.memory_space<vmem>>, %arg11: memref<1x64xf32, #tpu.memory_space<vmem>>, %arg12: memref<2x1x8x96xf32, #tpu.memory_space<vmem>>) attributes {dimension_semantics = [#tpu.dimension_semantics<parallel>, #tpu.dimension_semantics<parallel>], iteration_bounds = array<i64: 2, 1>, scalar_prefetch = 0 : i64, scratch_operands = 0 : i64, tpu.core_type = #tpu.core_type<tc>, window_params = [{transform_indices = @transform_0, window_bounds = array<i64: 1, 8, 32>}, {transform_indices = @transform_1, window_bounds = array<i64: 1, 8, 32>}, {pipeline_mode = #tpu.pipeline_mode<synchronous>, transform_indices = @transform_2, window_bounds = array<i64: 1, 32>}, {pipeline_mode = #tpu.pipeline_mode<synchronous>, transform_indices = @transform_3, window_bounds = array<i64: 1, 32>}, {pipeline_mode = #tpu.pipeline_mode<synchronous>, transform_indices = @transform_4, window_bounds = array<i64: 32, 192>}, {pipeline_mode = #tpu.pipeline_mode<synchronous>, transform_indices = @transform_5, window_bounds = array<i64: 1, 192>}, {pipeline_mode = #tpu.pipeline_mode<synchronous>, transform_indices = @transform_6, window_bounds = array<i64: 32, 64>}, {pipeline_mode = #tpu.pipeline_mode<synchronous>, transform_indices = @transform_7, window_bounds = array<i64: 1, 64>}, {pipeline_mode = #tpu.pipeline_mode<synchronous>, transform_indices = @transform_8, window_bounds = array<i64: 32, 64>}, {pipeline_mode = #tpu.pipeline_mode<synchronous>, transform_indices = @transform_9, window_bounds = array<i64: 1, 64>}, {transform_indices = @transform_10, window_bounds = array<i64: 2, 1, 8, 96>}]} {
    %c0 = arith.constant 0 : index
    %c0_0 = arith.constant 0 : index
    %c0_1 = arith.constant 0 : index
    %0 = vector.load %arg2[%c0, %c0_0, %c0_1] : memref<1x8x32xf32, #tpu.memory_space<vmem>>, vector<1x8x32xf32>
    %1 = vector.shape_cast %0 : vector<1x8x32xf32> to vector<8x32xf32>
    %c0_2 = arith.constant 0 : index
    %c0_3 = arith.constant 0 : index
    %2 = vector.load %arg4[%c0_2, %c0_3] : memref<1x32xf32, #tpu.memory_space<vmem>>, vector<1x32xf32>
    %3 = vector.broadcast %2 : vector<1x32xf32> to vector<8x32xf32>
    %4 = arith.mulf %1, %3 : vector<8x32xf32>
    %c0_4 = arith.constant 0 : index
    %c0_5 = arith.constant 0 : index
    %5 = vector.load %arg5[%c0_4, %c0_5] : memref<1x32xf32, #tpu.memory_space<vmem>>, vector<1x32xf32>
    %6 = vector.broadcast %5 : vector<1x32xf32> to vector<8x32xf32>
    %7 = arith.addf %4, %6 : vector<8x32xf32>
    %c0_6 = arith.constant 0 : index
    %c0_7 = arith.constant 0 : index
    %c0_8 = arith.constant 0 : index
    %8 = vector.load %arg3[%c0_6, %c0_7, %c0_8] : memref<1x8x32xf32, #tpu.memory_space<vmem>>, vector<1x8x32xf32>
    %9 = vector.shape_cast %8 : vector<1x8x32xf32> to vector<8x32xf32>
    %10 = arith.addf %7, %9 : vector<8x32xf32>
    %c0_9 = arith.constant 0 : index
    %c0_10 = arith.constant 0 : index
    %11 = vector.load %arg8[%c0_9, %c0_10] : memref<32x64xbf16, #tpu.memory_space<vmem>>, vector<32x64xbf16>
    %c0_11 = arith.constant 0 : index
    %c0_12 = arith.constant 0 : index
    %12 = vector.load %arg9[%c0_11, %c0_12] : memref<1x64xf32, #tpu.memory_space<vmem>>, vector<1x64xf32>
    %13 = arith.truncf %10 : vector<8x32xf32> to vector<8x32xbf16>
    %cst = arith.constant dense<0.000000e+00> : vector<8x64xf32>
    %14 = tpu.matmul %13, %11, %cst {dimension_numbers = #tpu.dot_dimension_numbers<[1], [0], [0], [1], [0, 0, 1, 1], [], []>} : vector<8x32xbf16>, vector<32x64xbf16>, vector<8x64xf32> -> vector<8x64xf32>
    %15 = vector.broadcast %12 : vector<1x64xf32> to vector<8x64xf32>
    %16 = arith.addf %14, %15 : vector<8x64xf32>
    %17 = vector.extract_strided_slice %16 {offsets = [0, 0], sizes = [8, 32], strides = [1, 1]} : vector<8x64xf32> to vector<8x32xf32>
    %cst_13 = arith.constant 0.000000e+00 : f32
    %18 = vector.broadcast %cst_13 : f32 to vector<8x32xf32>
    %19 = arith.maximumf %17, %18 : vector<8x32xf32>
    %20 = vector.extract_strided_slice %16 {offsets = [0, 32], sizes = [8, 32], strides = [1, 1]} : vector<8x64xf32> to vector<8x32xf32>
    %21 = arith.negf %20 : vector<8x32xf32>
    %22 = math.exp %21 : vector<8x32xf32>
    %cst_14 = arith.constant 1.000000e+00 : f32
    %23 = vector.broadcast %cst_14 : f32 to vector<8x32xf32>
    %24 = arith.addf %23, %22 : vector<8x32xf32>
    %25 = arith.divf %23, %24 : vector<8x32xf32>
    %26 = arith.mulf %19, %25 : vector<8x32xf32>
    %cst_15 = arith.constant 1.000000e+00 : f32
    %27 = vector.broadcast %cst_15 : f32 to vector<8x32xf32>
    %28 = arith.subf %27, %25 : vector<8x32xf32>
    %29 = arith.mulf %10, %28 : vector<8x32xf32>
    %30 = arith.addf %26, %29 : vector<8x32xf32>
    %c0_16 = arith.constant 0 : index
    %c0_17 = arith.constant 0 : index
    %31 = vector.load %arg10[%c0_16, %c0_17] : memref<32x64xbf16, #tpu.memory_space<vmem>>, vector<32x64xbf16>
    %c0_18 = arith.constant 0 : index
    %c0_19 = arith.constant 0 : index
    %32 = vector.load %arg11[%c0_18, %c0_19] : memref<1x64xf32, #tpu.memory_space<vmem>>, vector<1x64xf32>
    %33 = arith.truncf %30 : vector<8x32xf32> to vector<8x32xbf16>
    %cst_20 = arith.constant dense<0.000000e+00> : vector<8x64xf32>
    %34 = tpu.matmul %33, %31, %cst_20 {dimension_numbers = #tpu.dot_dimension_numbers<[1], [0], [0], [1], [0, 0, 1, 1], [], []>} : vector<8x32xbf16>, vector<32x64xbf16>, vector<8x64xf32> -> vector<8x64xf32>
    %35 = vector.broadcast %32 : vector<1x64xf32> to vector<8x64xf32>
    %36 = arith.addf %34, %35 : vector<8x64xf32>
    %37 = vector.extract_strided_slice %36 {offsets = [0, 0], sizes = [8, 32], strides = [1, 1]} : vector<8x64xf32> to vector<8x32xf32>
    %cst_21 = arith.constant 0.000000e+00 : f32
    %38 = vector.broadcast %cst_21 : f32 to vector<8x32xf32>
    %39 = arith.maximumf %37, %38 : vector<8x32xf32>
    %40 = vector.extract_strided_slice %36 {offsets = [0, 32], sizes = [8, 32], strides = [1, 1]} : vector<8x64xf32> to vector<8x32xf32>
    %41 = arith.negf %40 : vector<8x32xf32>
    %42 = math.exp %41 : vector<8x32xf32>
    %cst_22 = arith.constant 1.000000e+00 : f32
    %43 = vector.broadcast %cst_22 : f32 to vector<8x32xf32>
    %44 = arith.addf %43, %42 : vector<8x32xf32>
    %45 = arith.divf %43, %44 : vector<8x32xf32>
    %46 = arith.mulf %39, %45 : vector<8x32xf32>
    %cst_23 = arith.constant 1.000000e+00 : f32
    %47 = vector.broadcast %cst_23 : f32 to vector<8x32xf32>
    %48 = arith.subf %47, %45 : vector<8x32xf32>
    %49 = arith.mulf %30, %48 : vector<8x32xf32>
    %50 = arith.addf %46, %49 : vector<8x32xf32>
    %51 = arith.truncf %50 : vector<8x32xf32> to vector<8x32xbf16>
    %c0_24 = arith.constant 0 : index
    %c0_25 = arith.constant 0 : index
    %52 = vector.load %arg6[%c0_24, %c0_25] : memref<32x192xbf16, #tpu.memory_space<vmem>>, vector<32x192xbf16>
    %cst_26 = arith.constant dense<0.000000e+00> : vector<8x192xf32>
    %53 = tpu.matmul %51, %52, %cst_26 {dimension_numbers = #tpu.dot_dimension_numbers<[1], [0], [0], [1], [0, 0, 1, 1], [], []>} : vector<8x32xbf16>, vector<32x192xbf16>, vector<8x192xf32> -> vector<8x192xf32>
    %c0_27 = arith.constant 0 : index
    %c0_28 = arith.constant 0 : index
    %54 = vector.load %arg7[%c0_27, %c0_28] : memref<1x192xf32, #tpu.memory_space<vmem>>, vector<1x192xf32>
    %55 = vector.broadcast %54 : vector<1x192xf32> to vector<8x192xf32>
    %56 = arith.addf %53, %55 : vector<8x192xf32>
    %57 = vector.extract_strided_slice %56 {offsets = [0, 0], sizes = [8, 96], strides = [1, 1]} : vector<8x192xf32> to vector<8x96xf32>
    %c0_29 = arith.constant 0 : index
    %c0_30 = arith.constant 0 : index
    %c0_31 = arith.constant 0 : index
    %c0_32 = arith.constant 0 : index
    %58 = vector.load %arg12[%c0_29, %c0_30, %c0_31, %c0_32] : memref<2x1x8x96xf32, #tpu.memory_space<vmem>>, vector<1x1x8x96xf32>
    %59 = vector.shape_cast %58 : vector<1x1x8x96xf32> to vector<8x96xf32>
    %60 = vector.shape_cast %57 : vector<8x96xf32> to vector<1x1x8x96xf32>
    tpu.vector_store %arg12[%c0_29, %c0_30, %c0_31, %c0_32], %60 {strides = array<i32>} : memref<2x1x8x96xf32, #tpu.memory_space<vmem>>, vector<1x1x8x96xf32>,
    %61 = vector.extract_strided_slice %56 {offsets = [0, 96], sizes = [8, 96], strides = [1, 1]} : vector<8x192xf32> to vector<8x96xf32>
    %c1 = arith.constant 1 : index
    %c0_33 = arith.constant 0 : index
    %c0_34 = arith.constant 0 : index
    %c0_35 = arith.constant 0 : index
    %62 = vector.load %arg12[%c1, %c0_33, %c0_34, %c0_35] : memref<2x1x8x96xf32, #tpu.memory_space<vmem>>, vector<1x1x8x96xf32>
    %63 = vector.shape_cast %62 : vector<1x1x8x96xf32> to vector<8x96xf32>
    %64 = vector.shape_cast %61 : vector<8x96xf32> to vector<1x1x8x96xf32>
    tpu.vector_store %arg12[%c1, %c0_33, %c0_34, %c0_35], %64 {strides = array<i32>} : memref<2x1x8x96xf32, #tpu.memory_space<vmem>>, vector<1x1x8x96xf32>,
    return
  }
  func.func @transform_0(%arg0: i32, %arg1: i32) -> (i32, i32, i32) {
    %c0_i32 = arith.constant 0 : i32
    %c0_i32_0 = arith.constant 0 : i32
    return %arg0, %arg1, %c0_i32 : i32, i32, i32
  }
  func.func @transform_1(%arg0: i32, %arg1: i32) -> (i32, i32, i32) {
    %c0_i32 = arith.constant 0 : i32
    %c0_i32_0 = arith.constant 0 : i32
    return %arg0, %arg1, %c0_i32 : i32, i32, i32
  }
  func.func @transform_2(%arg0: i32, %arg1: i32) -> (i32, i32) {
    %c0_i32 = arith.constant 0 : i32
    %c0_i32_0 = arith.constant 0 : i32
    %c0_i32_1 = arith.constant 0 : i32
    return %c0_i32, %c0_i32_0 : i32, i32
  }
  func.func @transform_3(%arg0: i32, %arg1: i32) -> (i32, i32) {
    %c0_i32 = arith.constant 0 : i32
    %c0_i32_0 = arith.constant 0 : i32
    %c0_i32_1 = arith.constant 0 : i32
    return %c0_i32, %c0_i32_0 : i32, i32
  }
  func.func @transform_4(%arg0: i32, %arg1: i32) -> (i32, i32) {
    %c0_i32 = arith.constant 0 : i32
    %c0_i32_0 = arith.constant 0 : i32
    %c0_i32_1 = arith.constant 0 : i32
    return %c0_i32, %c0_i32_0 : i32, i32
  }
  func.func @transform_5(%arg0: i32, %arg1: i32) -> (i32, i32) {
    %c0_i32 = arith.constant 0 : i32
    %c0_i32_0 = arith.constant 0 : i32
    %c0_i32_1 = arith.constant 0 : i32
    return %c0_i32, %c0_i32_0 : i32, i32
  }
  func.func @transform_6(%arg0: i32, %arg1: i32) -> (i32, i32) {
    %c0_i32 = arith.constant 0 : i32
    %c0_i32_0 = arith.constant 0 : i32
    %c0_i32_1 = arith.constant 0 : i32
    return %c0_i32, %c0_i32_0 : i32, i32
  }
  func.func @transform_7(%arg0: i32, %arg1: i32) -> (i32, i32) {
    %c0_i32 = arith.constant 0 : i32
    %c0_i32_0 = arith.constant 0 : i32
    %c0_i32_1 = arith.constant 0 : i32
    return %c0_i32, %c0_i32_0 : i32, i32
  }
  func.func @transform_8(%arg0: i32, %arg1: i32) -> (i32, i32) {
    %c0_i32 = arith.constant 0 : i32
    %c0_i32_0 = arith.constant 0 : i32
    %c0_i32_1 = arith.constant 0 : i32
    return %c0_i32, %c0_i32_0 : i32, i32
  }
  func.func @transform_9(%arg0: i32, %arg1: i32) -> (i32, i32) {
    %c0_i32 = arith.constant 0 : i32
    %c0_i32_0 = arith.constant 0 : i32
    %c0_i32_1 = arith.constant 0 : i32
    return %c0_i32, %c0_i32_0 : i32, i32
  }
  func.func @transform_10(%arg0: i32, %arg1: i32) -> (i32, i32, i32, i32) {
    %c0_i32 = arith.constant 0 : i32
    %c0_i32_0 = arith.constant 0 : i32
    %c0_i32_1 = arith.constant 0 : i32
    return %c0_i32, %arg0, %arg1, %c0_i32_0 : i32, i32, i32, i32
  }
}

module attributes {stable_mosaic.version = 11 : i64} {
  func.func @_gru_kernel(%arg0: i32, %arg1: i32, %arg2: memref<1x8x2x96xf32, #tpu.memory_space<vmem>>, %arg3: memref<1x32x96xbf16, #tpu.memory_space<vmem>>, %arg4: memref<1x1x96xf32, #tpu.memory_space<vmem>>, %arg5: memref<1x8x2x32xf32, #tpu.memory_space<vmem>>, %arg6: memref<2x32xf32, #tpu.memory_space<vmem>>) attributes {dimension_semantics = [#tpu.dimension_semantics<parallel>, #tpu.dimension_semantics<arbitrary>], iteration_bounds = array<i64: 2, 1>, scalar_prefetch = 0 : i64, scratch_operands = 1 : i64, tpu.core_type = #tpu.core_type<tc>, window_params = [{transform_indices = @transform_0, window_bounds = array<i64: 1, 8, 2, 96>}, {transform_indices = @transform_1, window_bounds = array<i64: 1, 32, 96>}, {transform_indices = @transform_2, window_bounds = array<i64: 1, 1, 96>}, {transform_indices = @transform_3, window_bounds = array<i64: 1, 8, 2, 32>}]} {
    %c0_i32 = arith.constant 0 : i32
    %0 = arith.cmpi eq, %arg1, %c0_i32 : i32
    %1 = arith.extui %0 : i1 to i32
    %c0_i32_0 = arith.constant 0 : i32
    %2 = arith.cmpi ne, %1, %c0_i32_0 : i32
    scf.if %2 {
      %cst = arith.constant 0.000000e+00 : f32
      %14 = vector.broadcast %cst : f32 to vector<2x32xf32>
      %c0_11 = arith.constant 0 : index
      %c0_12 = arith.constant 0 : index
      %15 = vector.load %arg6[%c0_11, %c0_12] : memref<2x32xf32, #tpu.memory_space<vmem>>, vector<2x32xf32>
      tpu.vector_store %arg6[%c0_11, %c0_12], %14 {strides = array<i32>} : memref<2x32xf32, #tpu.memory_space<vmem>>, vector<2x32xf32>,
    } else {
    }
    %c0_i32_1 = arith.constant 0 : i32
    %3 = arith.muli %arg0, %c0_i32_1 : i32
    %c2_i32 = arith.constant 2 : i32
    %4 = arith.muli %c2_i32, %arg0 : i32
    %c1_i32 = arith.constant 1 : i32
    %5 = arith.subi %c1_i32, %4 : i32
    %6 = arith.muli %5, %arg1 : i32
    %7 = arith.addi %3, %6 : i32
    %c8_i32 = arith.constant 8 : i32
    %8 = arith.muli %7, %c8_i32 : i32
    %c0 = arith.constant 0 : index
    %c0_2 = arith.constant 0 : index
    %c0_3 = arith.constant 0 : index
    %9 = vector.load %arg3[%c0, %c0_2, %c0_3] : memref<1x32x96xbf16, #tpu.memory_space<vmem>>, vector<1x32x96xbf16>
    %10 = vector.shape_cast %9 : vector<1x32x96xbf16> to vector<32x96xbf16>
    %c0_4 = arith.constant 0 : index
    %c0_5 = arith.constant 0 : index
    %c0_6 = arith.constant 0 : index
    %11 = vector.load %arg4[%c0_4, %c0_5, %c0_6] : memref<1x1x96xf32, #tpu.memory_space<vmem>>, vector<1x1x96xf32>
    %12 = vector.shape_cast %11 : vector<1x1x96xf32> to vector<1x96xf32>
    %c0_i32_7 = arith.constant 0 : i32
    %c8_i32_8 = arith.constant 8 : i32
    %13 = arith.addi %c0_i32_7, %c8_i32_8 : i32
    %c1_i32_9 = arith.constant 1 : i32
    scf.for %arg7 = %c0_i32_7 to %13 step %c1_i32_9  : i32 {
      %c7_i32 = arith.constant 7 : i32
      %14 = arith.muli %arg0, %c7_i32 : i32
      %c2_i32_11 = arith.constant 2 : i32
      %15 = arith.muli %c2_i32_11, %arg0 : i32
      %c1_i32_12 = arith.constant 1 : i32
      %16 = arith.subi %c1_i32_12, %15 : i32
      %17 = arith.muli %16, %arg7 : i32
      %18 = arith.addi %14, %17 : i32
      %c0_13 = arith.constant 0 : index
      %19 = arith.index_cast %18 : i32 to index
      %c0_14 = arith.constant 0 : index
      %c0_15 = arith.constant 0 : index
      %20 = vector.load %arg2[%c0_13, %19, %c0_14, %c0_15] : memref<1x8x2x96xf32, #tpu.memory_space<vmem>>, vector<1x1x2x96xf32>
      %21 = vector.shape_cast %20 : vector<1x1x2x96xf32> to vector<2x96xf32>
      %c0_16 = arith.constant 0 : index
      %c0_17 = arith.constant 0 : index
      %22 = vector.load %arg6[%c0_16, %c0_17] : memref<2x32xf32, #tpu.memory_space<vmem>>, vector<2x32xf32>
      %23 = arith.truncf %22 : vector<2x32xf32> to vector<2x32xbf16>
      %cst = arith.constant dense<0.000000e+00> : vector<2x96xf32>
      %24 = tpu.matmul %23, %10, %cst {dimension_numbers = #tpu.dot_dimension_numbers<[1], [0], [0], [1], [0, 0, 1, 1], [], []>} : vector<2x32xbf16>, vector<32x96xbf16>, vector<2x96xf32> -> vector<2x96xf32>
      %25 = vector.broadcast %12 : vector<1x96xf32> to vector<2x96xf32>
      %26 = arith.addf %24, %25 : vector<2x96xf32>
      %27 = vector.extract_strided_slice %21 {offsets = [0, 0], sizes = [2, 32], strides = [1, 1]} : vector<2x96xf32> to vector<2x32xf32>
      %28 = vector.extract_strided_slice %26 {offsets = [0, 0], sizes = [2, 32], strides = [1, 1]} : vector<2x96xf32> to vector<2x32xf32>
      %29 = arith.addf %27, %28 : vector<2x32xf32>
      %30 = arith.negf %29 : vector<2x32xf32>
      %31 = math.exp %30 : vector<2x32xf32>
      %cst_18 = arith.constant 1.000000e+00 : f32
      %32 = vector.broadcast %cst_18 : f32 to vector<2x32xf32>
      %33 = arith.addf %32, %31 : vector<2x32xf32>
      %34 = arith.divf %32, %33 : vector<2x32xf32>
      %35 = vector.extract_strided_slice %21 {offsets = [0, 32], sizes = [2, 32], strides = [1, 1]} : vector<2x96xf32> to vector<2x32xf32>
      %36 = vector.extract_strided_slice %26 {offsets = [0, 32], sizes = [2, 32], strides = [1, 1]} : vector<2x96xf32> to vector<2x32xf32>
      %37 = arith.addf %35, %36 : vector<2x32xf32>
      %38 = arith.negf %37 : vector<2x32xf32>
      %39 = math.exp %38 : vector<2x32xf32>
      %cst_19 = arith.constant 1.000000e+00 : f32
      %40 = vector.broadcast %cst_19 : f32 to vector<2x32xf32>
      %41 = arith.addf %40, %39 : vector<2x32xf32>
      %42 = arith.divf %40, %41 : vector<2x32xf32>
      %43 = vector.extract_strided_slice %21 {offsets = [0, 64], sizes = [2, 32], strides = [1, 1]} : vector<2x96xf32> to vector<2x32xf32>
      %44 = vector.extract_strided_slice %26 {offsets = [0, 64], sizes = [2, 32], strides = [1, 1]} : vector<2x96xf32> to vector<2x32xf32>
      %45 = arith.mulf %34, %44 : vector<2x32xf32>
      %46 = arith.addf %43, %45 : vector<2x32xf32>
      %47 = math.tanh %46 : vector<2x32xf32>
      %cst_20 = arith.constant 1.000000e+00 : f32
      %48 = vector.broadcast %cst_20 : f32 to vector<2x32xf32>
      %49 = arith.subf %48, %42 : vector<2x32xf32>
      %50 = arith.mulf %49, %47 : vector<2x32xf32>
      %51 = arith.mulf %42, %22 : vector<2x32xf32>
      %52 = arith.addf %50, %51 : vector<2x32xf32>
      %53 = arith.addi %8, %18 : i32
      %c8_i32_21 = arith.constant 8 : i32
      %54 = arith.cmpi slt, %53, %c8_i32_21 : i32
      %55 = arith.select %54, %52, %22 : vector<2x32xf32>
      %c0_22 = arith.constant 0 : index
      %c0_23 = arith.constant 0 : index
      %56 = vector.load %arg6[%c0_22, %c0_23] : memref<2x32xf32, #tpu.memory_space<vmem>>, vector<2x32xf32>
      tpu.vector_store %arg6[%c0_22, %c0_23], %55 {strides = array<i32>} : memref<2x32xf32, #tpu.memory_space<vmem>>, vector<2x32xf32>,
      %c0_24 = arith.constant 0 : index
      %57 = arith.index_cast %18 : i32 to index
      %c0_25 = arith.constant 0 : index
      %c0_26 = arith.constant 0 : index
      %58 = vector.load %arg5[%c0_24, %57, %c0_25, %c0_26] : memref<1x8x2x32xf32, #tpu.memory_space<vmem>>, vector<1x1x2x32xf32>
      %59 = vector.shape_cast %58 : vector<1x1x2x32xf32> to vector<2x32xf32>
      %60 = vector.shape_cast %55 : vector<2x32xf32> to vector<1x1x2x32xf32>
      tpu.vector_store %arg5[%c0_24, %57, %c0_25, %c0_26], %60 {strides = array<i32>} : memref<1x8x2x32xf32, #tpu.memory_space<vmem>>, vector<1x1x2x32xf32>,
    }
    %c8_i32_10 = arith.constant 8 : i32
    return
  }
  func.func @transform_0(%arg0: i32, %arg1: i32) -> (i32, i32, i32, i32) {
    %c0_i32 = arith.constant 0 : i32
    %0 = arith.muli %arg0, %c0_i32 : i32
    %c2_i32 = arith.constant 2 : i32
    %1 = arith.muli %c2_i32, %arg0 : i32
    %c1_i32 = arith.constant 1 : i32
    %2 = arith.subi %c1_i32, %1 : i32
    %3 = arith.muli %2, %arg1 : i32
    %4 = arith.addi %0, %3 : i32
    %c0_i32_0 = arith.constant 0 : i32
    %c0_i32_1 = arith.constant 0 : i32
    %c0_i32_2 = arith.constant 0 : i32
    return %arg0, %4, %c0_i32_0, %c0_i32_1 : i32, i32, i32, i32
  }
  func.func @transform_1(%arg0: i32, %arg1: i32) -> (i32, i32, i32) {
    %c0_i32 = arith.constant 0 : i32
    %c0_i32_0 = arith.constant 0 : i32
    %c0_i32_1 = arith.constant 0 : i32
    return %arg0, %c0_i32, %c0_i32_0 : i32, i32, i32
  }
  func.func @transform_2(%arg0: i32, %arg1: i32) -> (i32, i32, i32) {
    %c0_i32 = arith.constant 0 : i32
    %c0_i32_0 = arith.constant 0 : i32
    %c0_i32_1 = arith.constant 0 : i32
    return %arg0, %c0_i32, %c0_i32_0 : i32, i32, i32
  }
  func.func @transform_3(%arg0: i32, %arg1: i32) -> (i32, i32, i32, i32) {
    %c0_i32 = arith.constant 0 : i32
    %0 = arith.muli %arg0, %c0_i32 : i32
    %c2_i32 = arith.constant 2 : i32
    %1 = arith.muli %c2_i32, %arg0 : i32
    %c1_i32 = arith.constant 1 : i32
    %2 = arith.subi %c1_i32, %1 : i32
    %3 = arith.muli %2, %arg1 : i32
    %4 = arith.addi %0, %3 : i32
    %c0_i32_0 = arith.constant 0 : i32
    %c0_i32_1 = arith.constant 0 : i32
    %c0_i32_2 = arith.constant 0 : i32
    return %arg0, %4, %c0_i32_0, %c0_i32_1 : i32, i32, i32, i32
  }
}

</mosaic_0001>

<bundles_post_ra>
// kernel: cbhg_forward.5
= control target key start
LH: loop header
LB: loop body
LE: loop exit
PB: predicated region body
PF: predicated region fallthrough
CT: control target
= control target key end

     0   :  { %11 = vsyncpa [#allocation3], 0  ;;  %s950_s18 = smov 0   ;;  %s952_s19 = smov 0   ;;  %s1037_s0 = inlined_call_operand.vmem [shape: f32[2,8,32], index: 0, kind: input, shape index: {}, may-alias: {0,1,2}]   ;;  %s1038_s1 = inlined_call_operand.vmem [shape: f32[2,8,32], index: 1, kind: input, shape index: {}, may-alias: {0,1,2}]   ;;  %s1039_s2 = inlined_call_operand.vmem [shape: f32[2,8,32], index: 2, kind: input, shape index: {}, may-alias: {0,1,2}]   ;;  %s1040_s3 = inlined_call_operand.hbm [shape: bf16[128,128], index: 3, kind: input, shape index: {}]   ;;  %s1041_s4 = inlined_call_operand.vmem [shape: f32[2,8,128], index: 4, kind: output, shape index: {0}]   ;;  %s1042_s5 = inlined_call_operand.vmem [shape: f32[2,1,2,128], index: 5, kind: output, shape index: {1}]  }
   0x1   :  { %s954_s0 = smov 0  }
   0x2 LB: > { %s745_s2 = sadd.s32 4294967295, %s910_s0   ;;  %s29_s20 = sadd.s32 1, %s906_s19  ;;  %s910_s0 = sphi %s954_s0, %s17_s0   ;;  %s906_s19 = sphi %s952_s19, %s1052_s19   ;;  %s902_s18 = sphi %s950_s18, %s1051_s18  }
   0x3   : > { %p31_p0 = scmp.ge.s32.totalorder %s29_s20, 2  ;;  %p747_p1 = scmp.ge.s32.totalorder %s910_s0, 1 }
   0x4   : > { %p207_p2 = scmp.lt.s32.totalorder %s910_s0, 3  ;;  %p975_p4 = scmp.eq.s32.totalorder %s745_s2, 0 }
   0x5   : > { %s1054_s20 = smov (%p31_p0, %s29_s20), 0  ;;  %s912_s23 = smov [#allocation2]  }
   0x6   : > { %p971_p3 = pnand %p747_p1, %p207_p2  ;;  %s219_s24 = sshll.u32 %s912_s23, 4  ;;  %s220_s24 = int_to_ptr.vmem [resolvable:$true] %s219_s24 }
   0x7   : > { %s1047_s22 = scalar_select %p975_p4, 1, 0 }
   0x8   : > { %s1046_s21 = scalar_select %p971_p3, 1, 0 }
   0x9   : > { %p800_p5 = pneg %p971_p3  ;;  %s856_s28 = scalar_lea.hbm %s1040_s3, 1024 }
   0xa   : > { %p857_p7 = scmp.ne.s32.totalorder %s1040_s3, %s856_s28  ;;  %p863_p11 = scmp.lt.u32.totalorder %s856_s28, %s1040_s3 }
   0xb   : > { %p983_p6 = pnand %p975_p4, %p800_p5 }
   0xd   : > { %p858_p8 = pneg %p983_p6 }
   0xf   : > { %p859_p9 = pnand %p858_p8, %p857_p7 }
  0x11   : > { %p860_p10 = pneg %p859_p9 }
  0x13   : > { %p865_p12 = pnand %p863_p11, %p860_p10 }
  0x15   : > { %868 = shalt.err (!%p865_p12)
}
  0x16   : > { %s869_s8 = scalar_lea.vmem %s220_s24, 1024  ;;  %p877_p2 = scmp.lt.s32.totalorder %s220_s24, %s220_s24 }
  0x17   : > { %p870_p13 = scmp.ne.s32.totalorder %s220_s24, %s869_s8  ;;  %p878_p5 = scmp.lt.s32.totalorder %s869_s8, %s869_s8 }
  0x19   : > { %p872_p0 = pnand %p870_p13, %p858_p8  ;;  %p879_p4 = por %p878_p5, %p877_p2 }
  0x1b   : > { %p873_p1 = pneg %p872_p0 }
  0x1d   : > { %p880_p3 = pnand %p879_p4, %p873_p1 }
  0x1f   : > { %883 = shalt.err (!%p880_p3)
}
  0x20   : > { %s913_s9 = smov 64   ;;  %s914_s10 = smov 4  }
  0x21   : > { %803 = dma.hbm_to_vmem [thread:$0]  (!%p983_p6), %s1040_s3, 1024, %s220_s24, [#allocation3], %s913_s9, %s913_s9, %s914_s10  }
  0x22   : > { %p1049_p7 = scmp.ne.s32.totalorder %s1046_s21, 0 }
  0x23   : > { %p1050_p9 = scmp.ne.s32.totalorder (!%p1049_p7), %s1047_s22, 0 }
  0x24   : > { %277 = sbr.rel (%p1049_p7) target bundleno = 411 (0x19b), region = 36 }
  0x2b   : > { %897 = dma.done.wait (%p1050_p9), [#allocation3], 1024  }
  0x2c   : > { %899 = vsyncadd (%p1050_p9), [#allocation3], 4294966272  ;;  %p349_p3 = scmp.lt.s32.totalorder %s902_s18, 1  ;;  %v915_v0 = vmov 0.0   ;;  %vm421_vm0 = vcmask 1045504   ;;  %vm916_vm1 = vmmov 0  }
  0x2d   : > { %776 = vmatprep.subr.bf16.mxu0 %v915_v0  ;;  %v423_v1 = vrot.slane %v915_v0, 2  ;;  %v433_v2 = vrot.slane %v915_v0, 3  ;;  %792 = vmatprep.mubr.msk.bf16.mxu0 %vm916_vm1, %v915_v0  ;;  %vm431_vm2 = vcmask 1044480   ;;  %v848_v7 = vld [vmem:[#allocation2] sm:$0xff]   ;;  %s917_s17 = smov 32   ;;  %v849_v10 = vld [vmem:[#allocation2 + $0x8] sm:$0xff]  }
  0x2e   : > { %s1056_s18 = smov (!%p349_p3, %s902_s18), 1  ;;  %777 = vmatpush3.bf16.msra.mxu0 %v848_v7  ;;  %s918_s2 = smov 96   ;;  %v850_v13 = vld [vmem:[#allocation2 + $0x10] sm:$0xff]   ;;  %v851_v14 = vld [vmem:[#allocation2 + $0x18] sm:$0xff]   ;;  %v852_v15 = vld [vmem:[#allocation2 + $0x20] sm:$0xff]   ;;  %vm441_vm3 = vcmask 261120  }
  0x2f   : > { %s753_s13 = sshll.u32 %s1056_s18, 3  ;;  %778 = vmatprep.subr.bf16.mxu0 %v915_v0  ;;  %s919_s21 = smov 64   ;;  %v853_v16 = vld [vmem:[#allocation2 + $0x28] sm:$0xff]   ;;  %v854_v17 = vld [vmem:[#allocation2 + $0x30] sm:$0xff]   ;;  %v855_v18 = vld [vmem:[#allocation2 + $0x38] sm:$0xff]   ;;  %vm444_vm4 = vcmask 523264  }
  0x30   : > { %s355_s16 = scalar_lea.vmem %s1038_s1, %s753_s13  ;;  %vm447_vm5 = vcmask 785408   ;;  %s375_s24 = scalar_lea.vmem %s1041_s4, %s753_s13  ;;  %vm584_vm6 = vcmask 1040384  }
  0x31   : > { %v386_v3 = vld [vmem:[%s355_s16] sm:$0xff]  ;;  %s756_s25 = sshll.u32 %s1056_s18, 1 }
  0x32   : > { %v416_v4 = vrot.slane %v386_v3, 1  ;;  %v422_v5 = vrot.slane %v386_v3, 2  ;;  %v432_v6 = vrot.slane %v386_v3, 3  ;;  %779 = vmatpush3.bf16.msra.mxu0 %v849_v10  ;;  %s382_s28 = scalar_lea.vmem %s1042_s5, %s756_s25 }
  0x33   : > { %780 = vmatprep.subr.bf16.mxu0 %v915_v0 }
  0x34   : > { %417 = vrot.lane.b32.xlu0 %v416_v4, %s917_s17  ;;  %v424_v8 = vsel %vm421_vm0, %v422_v5, %v423_v1  ;;  %v434_v9 = vsel %vm431_vm2, %v432_v6, %v433_v2 }
  0x35   : > { %v838_v11 = vpack.i.bf16 %v424_v8, %v422_v5  ;;  %v843_v12 = vpack.i.bf16 %v434_v9, %v432_v6 }
  0x36   : > { %781 = vmatpush3.bf16.msra.mxu0 %v850_v13 }
  0x37   : > { %844 = vrot.lane.b32.xlu1 %v843_v12, %s918_s2  ;;  %782 = vmatprep.subr.bf16.mxu0 %v915_v0 }
  0x38   : > { %839 = vrot.lane.b32.xlu0 %v838_v11, %s919_s21 }
  0x3a   : > { %783 = vmatpush3.bf16.msra.mxu0 %v851_v14 }
  0x3b   : > { %784 = vmatprep.subr.bf16.mxu0 %v915_v0 }
  0x3e   : > { %785 = vmatpush3.bf16.msra.mxu0 %v852_v15 }
  0x3f   : > { %786 = vmatprep.subr.bf16.mxu0 %v915_v0 }
  0x42   : > { %787 = vmatpush3.bf16.msra.mxu0 %v853_v16 }
  0x43   : > { %788 = vmatprep.subr.bf16.mxu0 %v915_v0 }
  0x46   : > { %789 = vmatpush3.bf16.msra.mxu0 %v854_v17 }
  0x47   : > { %790 = vmatprep.subr.bf16.mxu0 %v915_v0 }
  0x4a   : > { %791 = vmatpush3.bf16.msra.mxu0 %v855_v18 }
  0xa6   : > { %v418_v19 = vpop.permute.xlu0 %417 }
  0xa7   : > { %v442_v26 = vsel %vm441_vm3, 0.0, %v418_v19  ;;  %v443_v27 = vsel %vm441_vm3, %v386_v3, %v418_v19 }
  0xa9   : > { %v845_v20 = vpop.permute.xlu1 %844 }
  0xaa   : > { %v840_v21 = vpop.permute.xlu0 %839  ;;  %v847_v22 = vunpack.i.h.bf16 %v845_v20  ;;  %v846_v23 = vunpack.i.l.bf16 %v845_v20 }
  0xab   : > { %v842_v24 = vunpack.i.h.bf16 %v840_v21  ;;  %v841_v25 = vunpack.i.l.bf16 %v840_v21 }
  0xad   : > { %v446_v28 = vsel %vm444_vm4, %v443_v27, %v842_v24  ;;  %v445_v29 = vsel %vm444_vm4, %v442_v26, %v841_v25 }
  0xae   : > { %v448_v30 = vsel %vm447_vm5, %v445_v29, %v846_v23  ;;  %v449_v31 = vsel %vm447_vm5, %v446_v28, %v847_v22 }
  0xaf   : > { %v450_v32 = vpack.c.bf16 %v449_v31, %v448_v30 }
  0xb1   : > { %v468_v33 = vshrl.u32 %v450_v32, 16  ;;  %v471_v34 = vshll.u32 %v450_v32, 16 }
  0xb3   : > { %v470_v35 = vrot.slane %v468_v33, 3  ;;  %v473_v36 = vrot.slane %v471_v34, 4 }
  0xb5   : > { %v474_v37 = vor.u32 %v473_v36, %v470_v35 }
  0xb7   : > { %793 = vmatmul.mubr.bf16.vlgmr.msra.gmra.mrb[0].mxu0 %v474_v37 }
 0x18a   : > { %v558_v38 = vpop.f32.mrb[0].mxu0 }
 0x18b   : > { %564 = vst [vmem:[%s375_s24] sm:$0xff] %v558_v38  ;;  %v571_v39 = vrot.slane %v558_v38, 4  ;;  %v577_v40 = vmul.f32 %v558_v38, %v558_v38  ;;  %v794_v41 = vpop.f32.mrb[1].mxu0 }
 0x18c   : > { %v561_v42 = vpop.f32.mrb[2].mxu0 }
 0x18d   : > { %v572_v43 = vadd.f32 %v571_v39, %v558_v38  ;;  %v578_v44 = vrot.slane %v577_v40, 4  ;;  %v795_v45 = vpop.f32.mrb[3].mxu0 }
 0x18f   : > { %v573_v46 = vrot.slane %v572_v43, 2  ;;  %v579_v47 = vadd.f32 %v578_v44, %v577_v40 }
 0x191   : > { %v574_v48 = vadd.f32 %v573_v46, %v572_v43  ;;  %v580_v49 = vrot.slane %v579_v47, 2 }
 0x193   : > { %v575_v50 = vrot.slane %v574_v48, 1  ;;  %v581_v51 = vadd.f32 %v580_v49, %v579_v47 }
 0x195   : > { %v582_v52 = vrot.slane %v581_v51, 1  ;;  %v576_v53 = vadd.f32 %v575_v50, %v574_v48 }
 0x197   : > { %v583_v54 = vadd.f32 %v582_v52, %v581_v51 }
 0x199   : > { %v585_v55 = vsel %vm584_vm6, %v576_v53, %v583_v54 }
 0x19a   : > { %586 = vst [vmem:[%s382_s28] sm:$0x3] %v585_v55 }
 0x19b PF: > { %s17_s0 = sadd.s32 1, %s910_s0   ;;  %s1051_s18 = smov %s906_s19 }
 0x19c   : > { %p14_p4 = scmp.ge.s32.totalorder %s17_s0, 4   ;;  %s1052_s19 = smov %s1054_s20 }
 0x19e   :  { %16 = sbr.rel (!%p14_p4) target bundleno = 2 (0x2), region = 89 }
 0x1a5   :  { %632 = vsyncpa [#allocation3], 1 }
 0x1a6   :  { %634 = vsyncpa [#allocation3 + $0x1], 1 }

// kernel: cbhg_forward.7
= control target key start
LH: loop header
LB: loop body
LE: loop exit
PB: predicated region body
PF: predicated region fallthrough
CT: control target
= control target key end

     0   :  { %s922_s23 = smov 0   ;;  %s924_s24 = smov 0   ;;  %s995_s0 = inlined_call_operand.vmem [shape: f32[2,8,32], index: 0, kind: input, shape index: {}, may-alias: {0,1,2}]   ;;  %s996_s1 = inlined_call_operand.vmem [shape: f32[2,8,32], index: 1, kind: input, shape index: {}, may-alias: {0,1,2}]   ;;  %s997_s2 = inlined_call_operand.vmem [shape: f32[2,8,32], index: 2, kind: input, shape index: {}, may-alias: {0,1,2}]   ;;  %s998_s3 = inlined_call_operand.vmem [shape: f32[1,32], index: 3, kind: input, shape index: {}]   ;;  %s999_s4 = inlined_call_operand.vmem [shape: f32[1,32], index: 4, kind: input, shape index: {}]   ;;  %s1000_s5 = inlined_call_operand.vmem [shape: bf16[96,32], index: 5, kind: input, shape index: {}]   ;;  %s1001_s6 = inlined_call_operand.vmem [shape: f32[2,8,32], index: 6, kind: output, shape index: {0}]   ;;  %s1002_s7 = inlined_call_operand.vmem [shape: f32[2,1,2,32], index: 7, kind: output, shape index: {1}]  }
   0x1   :  { %s926_s2 = smov 0  }
   0x2 LB: > { %s30_s25 = sadd.s32 1, %s872_s24  ;;  %p775_p0 = scmp.ge.s32.totalorder %s876_s2, 1  ;;  %s876_s2 = sphi %s926_s2, %s18_s2   ;;  %s872_s24 = sphi %s924_s24, %s1004_s24   ;;  %s868_s23 = sphi %s922_s23, %s1003_s23  }
   0x3   : > { %p32_p1 = scmp.ge.s32.totalorder %s30_s25, 2  ;;  %p312_p2 = scmp.lt.s32.totalorder %s876_s2, 3 }
   0x5   : > { %s1006_s25 = smov (%p32_p1, %s30_s25), 0  ;;  %p313_p3 = pnand %p775_p0, %p312_p2 }
   0x6   : > { %p388_p4 = scmp.lt.s32.totalorder (!%p313_p3), %s868_s23, 1  ;;  %v848_v0 = vld [vmem:[%s1000_s5] sm:$0xff] (!%p313_p3)   ;;  %v878_v1 = vmov (!%p313_p3), 0.0   ;;  %v849_v2 = vld [vmem:[%s1000_s5 + $0x8] sm:$0xff] (!%p313_p3)   ;;  %v850_v7 = vld [vmem:[%s1000_s5 + $0x10] sm:$0xff] (!%p313_p3)   ;;  %vm483_vm0 = vcmask (!%p313_p3), 1045504  }
   0x7   : > { %316 = sbr.rel (%p313_p3) target bundleno = 385 (0x181), region = 44  ;;  %799 = vmatprep.subr.bf16.mxu0 (!%p313_p3), %v878_v1  ;;  %v781_v3 = vld [vmem:[%s998_s3] ss:$0 sm:$0xff] (!%p313_p3)  ;;  %v485_v10 = vrot.slane (!%p313_p3), %v878_v1, 2  ;;  %v851_v11 = vld [vmem:[%s1000_s5 + $0x18] sm:$0xff] (!%p313_p3)   ;;  %vm879_vm1 = vmmov (!%p313_p3), 0  }
   0x8   : > { %800 = vmatpush3.bf16.msra.mxu0 (!%p313_p3), %v848_v0  ;;  %v782_v4 = vld [vmem:[%s999_s4] ss:$0 sm:$0xff] (!%p313_p3)  ;;  %811 = vmatprep.mubr.msk.bf16.mxu0 (!%p313_p3), %vm879_vm1, %v878_v1  ;;  %s880_s19 = smov (!%p313_p3), 32   ;;  %s881_s22 = smov (!%p313_p3), 64   ;;  %v853_v17 = vld [vmem:[%s1000_s5 + $0x28] sm:$0xff] (!%p313_p3)   ;;  %vm493_vm2 = vcmask (!%p313_p3), 261120  }
   0x9   : > { %801 = vmatprep.subr.bf16.mxu0 (!%p313_p3), %v878_v1  ;;  %v852_v15 = vld [vmem:[%s1000_s5 + $0x20] sm:$0xff] (!%p313_p3)   ;;  %vm496_vm3 = vcmask (!%p313_p3), 523264   ;;  %vm556_vm4 = vcmask (!%p313_p3), 785408   ;;  %vm622_vm5 = vcmask (!%p313_p3), 1040384   ;;  %vm624_vm6 = vcmask (!%p313_p3), 254976  }
   0xc   : > { %802 = vmatpush3.bf16.msra.mxu0 (!%p313_p3), %v849_v2 }
   0xd   : > { %803 = vmatprep.subr.bf16.mxu0 (!%p313_p3), %v878_v1 }
   0xe   : > { %s1008_s23 = smov (!%p388_p4, %s868_s23), 1 }
   0xf   : > { %s777_s30 = sshll.u32 %s1008_s23, 3 }
  0x10   : > { %s394_s12 = scalar_lea.vmem %s996_s1, %s777_s30  ;;  %804 = vmatpush3.bf16.msra.mxu0 %v850_v7  ;;  %s414_s29 = scalar_lea.vmem %s1001_s6, %s777_s30 }
  0x11   : > { %v425_v5 = vld [vmem:[%s394_s12] sm:$0xff]  ;;  %805 = vmatprep.subr.bf16.mxu0 %v878_v1  ;;  %s780_s30 = sshll.u32 %s1008_s23, 1 }
  0x12   : > { %v453_v6 = vmul.f32 %v781_v3, %v425_v5  ;;  %s421_s10 = scalar_lea.vmem %s1002_s7, %s780_s30 }
  0x14   : > { %v463_v8 = vadd.f32 %v782_v4, %v453_v6  ;;  %806 = vmatpush3.bf16.msra.mxu0 %v851_v11 }
  0x15   : > { %807 = vmatprep.subr.bf16.mxu0 %v878_v1 }
  0x16   : > { %v466_v9 = vmax.f32 %v463_v8, 0.0 }
  0x18   : > { %v478_v12 = vrot.slane %v466_v9, 1  ;;  %v484_v13 = vrot.slane %v466_v9, 2  ;;  %808 = vmatpush3.bf16.msra.mxu0 %v852_v15 }
  0x19   : > { %809 = vmatprep.subr.bf16.mxu0 %v878_v1 }
  0x1a   : > { %479 = vrot.lane.b32.xlu0 %v478_v12, %s880_s19  ;;  %v486_v14 = vsel %vm483_vm0, %v484_v13, %v485_v10 }
  0x1b   : > { %v843_v16 = vpack.i.bf16 %v486_v14, %v484_v13 }
  0x1c   : > { %810 = vmatpush3.bf16.msra.mxu0 %v853_v17 }
  0x1e   : > { %844 = vrot.lane.b32.xlu0 %v843_v16, %s881_s22 }
  0x8c   : > { %v480_v18 = vpop.permute.xlu0 %479 }
  0x8d   : > { %v494_v22 = vsel %vm493_vm2, 0.0, %v480_v18  ;;  %v495_v23 = vsel %vm493_vm2, %v466_v9, %v480_v18 }
  0x90   : > { %v845_v19 = vpop.permute.xlu0 %844 }
  0x91   : > { %v847_v20 = vunpack.i.h.bf16 %v845_v19  ;;  %v846_v21 = vunpack.i.l.bf16 %v845_v19 }
  0x93   : > { %v498_v24 = vsel %vm496_vm3, %v495_v23, %v847_v20  ;;  %v497_v25 = vsel %vm496_vm3, %v494_v22, %v846_v21 }
  0x94   : > { %v499_v26 = vpack.c.bf16 %v498_v24, %v497_v25 }
  0x96   : > { %v513_v27 = vshrl.u32 %v499_v26, 16  ;;  %v516_v28 = vshll.u32 %v499_v26, 16 }
  0x98   : > { %v515_v29 = vrot.slane %v513_v27, 3  ;;  %v518_v30 = vrot.slane %v516_v28, 4 }
  0x9a   : > { %v519_v31 = vor.u32 %v518_v30, %v515_v29 }
  0x9c   : > { %812 = vmatmul.mubr.msk.bf16.vlgmr.msra.gmra.mrb[0].mxu0 %vm556_vm4, %v519_v31 }
 0x16f   : > { %v594_v32 = vpop.f32.mrb[0].mxu0 }
 0x170   : > { %600 = vst.msk [vmem:[%s414_s29] sm:$0xff] %vm493_vm2, %v594_v32  ;;  %v607_v33 = vsel %vm493_vm2, %v594_v32, 0.0  ;;  %v614_v34 = vmul.f32 %v594_v32, %v594_v32  ;;  %v813_v35 = vpop.f32.mrb[1].mxu0 }
 0x171   : > { %v608_v36 = vrot.slane %v607_v33, 4  ;;  %v597_v37 = vpop.f32.mrb[2].mxu0 }
 0x172   : > { %v615_v38 = vsel %vm493_vm2, %v614_v34, 0.0  ;;  %v814_v39 = vpop.f32.mrb[3].mxu0 }
 0x173   : > { %v609_v40 = vadd.f32 %v608_v36, %v607_v33  ;;  %v616_v41 = vrot.slane %v615_v38, 4 }
 0x175   : > { %v610_v42 = vrot.slane %v609_v40, 2  ;;  %v617_v43 = vadd.f32 %v616_v41, %v615_v38 }
 0x177   : > { %v611_v44 = vadd.f32 %v610_v42, %v609_v40  ;;  %v618_v45 = vrot.slane %v617_v43, 2 }
 0x179   : > { %v612_v46 = vrot.slane %v611_v44, 1  ;;  %v619_v47 = vadd.f32 %v618_v45, %v617_v43 }
 0x17b   : > { %v620_v48 = vrot.slane %v619_v47, 1  ;;  %v613_v49 = vadd.f32 %v612_v46, %v611_v44 }
 0x17d   : > { %v621_v50 = vadd.f32 %v620_v48, %v619_v47 }
 0x17f   : > { %v623_v51 = vsel %vm622_vm5, %v613_v49, %v621_v50 }
 0x180   : > { %625 = vst.msk [vmem:[%s421_s10] sm:$0x3] %vm624_vm6, %v623_v51 }
 0x181 PF: > { %s18_s2 = sadd.s32 1, %s876_s2   ;;  %s1003_s23 = smov %s872_s24 }
 0x182   : > { %p15_p5 = scmp.ge.s32.totalorder %s18_s2, 4   ;;  %s1004_s24 = smov %s1006_s25 }
 0x184   :  { %17 = sbr.rel (!%p15_p5) target bundleno = 2 (0x2), region = 92 }

// kernel: cbhg_forward.6
= control target key start
LH: loop header
LB: loop body
LE: loop exit
PB: predicated region body
PF: predicated region fallthrough
CT: control target
= control target key end

     0   :  { %s1181_s23 = smov 0   ;;  %s1183_s24 = smov 0   ;;  %s1319_s0 = inlined_call_operand.vmem [shape: f32[2,8,128], index: 0, kind: input, shape index: {}, may-alias: {0,1,2}]   ;;  %s1320_s1 = inlined_call_operand.vmem [shape: f32[2,8,128], index: 1, kind: input, shape index: {}, may-alias: {0,1,2}]   ;;  %s1321_s2 = inlined_call_operand.vmem [shape: f32[2,8,128], index: 2, kind: input, shape index: {}, may-alias: {0,1,2}]   ;;  %s1322_s3 = inlined_call_operand.vmem [shape: f32[1,128], index: 3, kind: input, shape index: {}]   ;;  %s1323_s4 = inlined_call_operand.vmem [shape: f32[1,128], index: 4, kind: input, shape index: {}]   ;;  %s1324_s5 = inlined_call_operand.vmem [shape: bf16[384,32], index: 5, kind: input, shape index: {}]   ;;  %s1325_s6 = inlined_call_operand.vmem [shape: f32[2,8,32], index: 6, kind: output, shape index: {0}]   ;;  %s1326_s7 = inlined_call_operand.vmem [shape: f32[2,1,2,32], index: 7, kind: output, shape index: {1}]  }
   0x1   :  { %s1185_s2 = smov 0  }
   0x2 LB: > { %s30_s25 = sadd.s32 1, %s1133_s24  ;;  %p980_p0 = scmp.ge.s32.totalorder %s1137_s2, 1  ;;  %s1137_s2 = sphi %s1185_s2, %s18_s2   ;;  %s1133_s24 = sphi %s1183_s24, %s1328_s24   ;;  %s1129_s23 = sphi %s1181_s23, %s1327_s23  }
   0x3   : > { %p32_p1 = scmp.ge.s32.totalorder %s30_s25, 2  ;;  %p312_p2 = scmp.lt.s32.totalorder %s1137_s2, 3 }
   0x5   : > { %s1330_s25 = smov (%p32_p1, %s30_s25), 0  ;;  %p313_p3 = pnand %p980_p0, %p312_p2 }
   0x6   : > { %v1091_v0 = vld [vmem:[%s1324_s5 + $0x40] sm:$0xff] (!%p313_p3)   ;;  %v1139_v1 = vmov (!%p313_p3), 0.0   ;;  %v1094_v4 = vld [vmem:[%s1324_s5 + $0x48] sm:$0xff] (!%p313_p3)   ;;  %v1097_v7 = vld [vmem:[%s1324_s5 + $0x50] sm:$0xff] (!%p313_p3)   ;;  %vm1140_vm0 = vmmov (!%p313_p3), 0   ;;  %p388_p4 = scmp.lt.s32.totalorder (!%p313_p3), %s1129_s23, 1 }
   0x7   : > { %316 = sbr.rel (%p313_p3) target bundleno = 274 (0x112), region = 44  ;;  %1045 = vmatprep.subr.bf16.mxu1 (!%p313_p3), %v1139_v1  ;;  %v1092_v2 = vld [vmem:[%s1324_s5] sm:$0xff] (!%p313_p3)   ;;  %1014 = vmatprep.subr.bf16.mxu0 (!%p313_p3), %v1091_v0  ;;  %v1095_v5 = vld [vmem:[%s1324_s5 + $0x8] sm:$0xff] (!%p313_p3)   ;;  %v1098_v8 = vld [vmem:[%s1324_s5 + $0x10] sm:$0xff] (!%p313_p3)   ;;  %v481_v31 = vrot.slane (!%p313_p3), %v1139_v1, 1  ;;  %vm479_vm1 = vcmask (!%p313_p3), 1046528  }
   0x8   : > { %v1093_v3 = vld [vmem:[%s1324_s5 + $0x80] sm:$0xff] (!%p313_p3)   ;;  %1015 = vmatpush3.bf16.msra.mxu0 (!%p313_p3), %v1092_v2  ;;  %v1096_v6 = vld [vmem:[%s1324_s5 + $0x88] sm:$0xff] (!%p313_p3)   ;;  %v1099_v9 = vld [vmem:[%s1324_s5 + $0x90] sm:$0xff] (!%p313_p3)   ;;  %1061 = vmatprep.mubr.msk.bf16.mxu1 (!%p313_p3), %vm1140_vm0, %v1139_v1  ;;  %v498_v35 = vrot.slane (!%p313_p3), %v1139_v1, 2  ;;  %vm496_vm2 = vcmask (!%p313_p3), 1045504   ;;  %vm804_vm3 = vcmask (!%p313_p3), 261120  }
   0x9   : > { %1046 = vmatpush3.bf16.msra.mxu1 (!%p313_p3), %v1093_v3  ;;  %1016 = vmatprep.subr.bf16.mxu0 (!%p313_p3), %v1094_v4  ;;  %v1100_v10 = vld [vmem:[%s1324_s5 + $0x58] sm:$0xff] (!%p313_p3)   ;;  %v1103_v13 = vld [vmem:[%s1324_s5 + $0x60] sm:$0xff] (!%p313_p3)   ;;  %v1106_v16 = vld [vmem:[%s1324_s5 + $0x68] sm:$0xff] (!%p313_p3)   ;;  %vm827_vm4 = vcmask (!%p313_p3), 1040384   ;;  %vm829_vm5 = vcmask (!%p313_p3), 254976  }
   0xa   : > { %1047 = vmatprep.subr.bf16.mxu1 (!%p313_p3), %v1139_v1  ;;  %v1101_v11 = vld [vmem:[%s1324_s5 + $0x18] sm:$0xff] (!%p313_p3)   ;;  %v1104_v14 = vld [vmem:[%s1324_s5 + $0x20] sm:$0xff] (!%p313_p3)   ;;  %v1107_v17 = vld [vmem:[%s1324_s5 + $0x28] sm:$0xff] (!%p313_p3)  }
   0xb   : > { %v1102_v12 = vld [vmem:[%s1324_s5 + $0x98] sm:$0xff] (!%p313_p3)   ;;  %v1105_v15 = vld [vmem:[%s1324_s5 + $0xa0] sm:$0xff] (!%p313_p3)   ;;  %v1108_v18 = vld [vmem:[%s1324_s5 + $0xa8] sm:$0xff] (!%p313_p3)  }
   0xc   : > { %1017 = vmatpush3.bf16.msra.mxu0 (!%p313_p3), %v1095_v5  ;;  %v1109_v19 = vld [vmem:[%s1324_s5 + $0x70] sm:$0xff] (!%p313_p3)   ;;  %v1112_v22 = vld [vmem:[%s1324_s5 + $0x78] sm:$0xff] (!%p313_p3)   ;;  %v986_v24 = vld [vmem:[%s1322_s3] ss:$0 sm:$0xff] (!%p313_p3) }
   0xd   : > { %1048 = vmatpush3.bf16.msra.mxu1 (!%p313_p3), %v1096_v6  ;;  %1018 = vmatprep.subr.bf16.mxu0 (!%p313_p3), %v1097_v7  ;;  %v1110_v20 = vld [vmem:[%s1324_s5 + $0x30] sm:$0xff] (!%p313_p3)   ;;  %v987_v25 = vld [vmem:[%s1323_s4] ss:$0 sm:$0xff] (!%p313_p3)  ;;  %v1113_v27 = vld [vmem:[%s1324_s5 + $0x38] sm:$0xff] (!%p313_p3)  }
   0xe   : > { %1049 = vmatprep.subr.bf16.mxu1 %v1139_v1  ;;  %s1332_s23 = smov (!%p388_p4, %s1129_s23), 1  ;;  %v1111_v21 = vld [vmem:[%s1324_s5 + $0xb0] sm:$0xff]   ;;  %v1114_v29 = vld [vmem:[%s1324_s5 + $0xb8] sm:$0xff]  }
   0xf   : > { %s982_s16 = sshll.u32 %s1332_s23, 3  ;;  %s985_s21 = sshll.u32 %s1332_s23, 1 }
  0x10   : > { %1019 = vmatpush3.bf16.msra.mxu0 %v1098_v8  ;;  %s394_s27 = scalar_lea.vmem %s1320_s1, %s982_s16  ;;  %s414_s20 = scalar_lea.vmem %s1325_s6, %s982_s16 }
  0x11   : > { %1050 = vmatpush3.bf16.msra.mxu1 %v1099_v9  ;;  %1020 = vmatprep.subr.bf16.mxu0 %v1100_v10  ;;  %v425_v23 = vld [vmem:[%s394_s27] sm:$0xff]  ;;  %s421_s0 = scalar_lea.vmem %s1326_s7, %s985_s21 }
  0x12   : > { %1051 = vmatprep.subr.bf16.mxu1 %v1139_v1  ;;  %v453_v26 = vmul.f32 %v986_v24, %v425_v23 }
  0x14   : > { %1021 = vmatpush3.bf16.msra.mxu0 %v1101_v11  ;;  %v463_v28 = vadd.f32 %v987_v25, %v453_v26 }
  0x15   : > { %1052 = vmatpush3.bf16.msra.mxu1 %v1102_v12  ;;  %1022 = vmatprep.subr.bf16.mxu0 %v1103_v13 }
  0x16   : > { %1053 = vmatprep.subr.bf16.mxu1 %v1139_v1  ;;  %v466_v30 = vmax.f32 %v463_v28, 0.0 }
  0x18   : > { %1023 = vmatpush3.bf16.msra.mxu0 %v1104_v14  ;;  %v480_v32 = vrot.slane %v466_v30, 1 }
  0x19   : > { %1054 = vmatpush3.bf16.msra.mxu1 %v1105_v15  ;;  %1024 = vmatprep.subr.bf16.mxu0 %v1106_v16 }
  0x1a   : > { %1055 = vmatprep.subr.bf16.mxu1 %v1139_v1  ;;  %v482_v33 = vsel %vm479_vm1, %v480_v32, %v481_v31 }
  0x1b   : > { %v487_v34 = vmax.f32 %v466_v30, %v482_v33 }
  0x1c   : > { %1025 = vmatpush3.bf16.msra.mxu0 %v1107_v17 }
  0x1d   : > { %1056 = vmatpush3.bf16.msra.mxu1 %v1108_v18  ;;  %1026 = vmatprep.subr.bf16.mxu0 %v1109_v19  ;;  %v493_v36 = vrot.slane %v487_v34, 1  ;;  %v502_v37 = vpack.c.bf16 %v487_v34, %v1139_v1  ;;  %v497_v38 = vrot.slane %v487_v34, 2 }
  0x1e   : > { %1057 = vmatprep.subr.bf16.mxu1 %v1139_v1 }
  0x1f   : > { %v503_v39 = vpack.c.bf16 %v493_v36, %v493_v36  ;;  %v554_v40 = vshrl.u32 %v502_v37, 16  ;;  %v557_v41 = vshll.u32 %v502_v37, 16  ;;  %v499_v42 = vsel %vm496_vm2, %v497_v38, %v498_v35 }
  0x20   : > { %1027 = vmatpush3.bf16.msra.mxu0 %v1110_v20  ;;  %v504_v43 = vpack.c.bf16 %v499_v42, %v497_v38 }
  0x21   : > { %1058 = vmatpush3.bf16.msra.mxu1 %v1111_v21  ;;  %1028 = vmatprep.subr.bf16.mxu0 %v1112_v22  ;;  %v562_v44 = vshrl.u32 %v503_v39, 16  ;;  %v565_v45 = vshll.u32 %v503_v39, 16  ;;  %v556_v46 = vrot.slane %v554_v40, 3  ;;  %v559_v47 = vrot.slane %v557_v41, 4 }
  0x22   : > { %1059 = vmatprep.subr.bf16.mxu1 %v1139_v1  ;;  %v570_v48 = vshrl.u32 %v504_v43, 16  ;;  %v573_v49 = vshll.u32 %v504_v43, 16 }
  0x23   : > { %v564_v50 = vrot.slane %v562_v44, 3  ;;  %v567_v51 = vrot.slane %v565_v45, 4  ;;  %v560_v52 = vor.u32 %v559_v47, %v556_v46 }
  0x24   : > { %1029 = vmatpush3.bf16.msra.mxu0 %v1113_v27  ;;  %v572_v53 = vrot.slane %v570_v48, 3  ;;  %v575_v54 = vrot.slane %v573_v49, 4 }
  0x25   : > { %1060 = vmatpush3.bf16.msra.mxu1 %v1114_v29  ;;  %v568_v55 = vor.u32 %v567_v51, %v564_v50 }
  0x26   : > { %v576_v56 = vor.u32 %v575_v54, %v572_v53 }
  0x27   : > { %756 = vmatprep.mubr.bf16.mxu0 %v568_v55 }
  0x28   : > { %757 = vmatmul.mubr.bf16.vlgmr.msra.gmra.mrb[0].mxu0 %v560_v52  ;;  %1062 = vmatmul.mubr.bf16.vlgmr.msra.gmra.mrb[0].mxu1 %v576_v56 }
  0xfb   : > { %v1030_v57 = vpop.f32.mrb[0].mxu0  ;;  %v798_v58 = vpop.f32.mrb[0].mxu1 }
  0xfc   : > { %v1031_v59 = vpop.f32.mrb[1].mxu0  ;;  %v1063_v60 = vpop.f32.mrb[1].mxu1 }
  0xfd   : > { %v1032_v61 = vadd.f32 %v1031_v59, %v1030_v57  ;;  %v1033_v62 = vpop.f32.mrb[2].mxu0  ;;  %v801_v63 = vpop.f32.mrb[2].mxu1 }
  0xfe   : > { %v1034_v0 = vpop.f32.mrb[3].mxu0  ;;  %v1064_v1 = vpop.f32.mrb[3].mxu1 }
  0xff   : > { %v799_v2 = vadd.f32 %v1032_v61, %v798_v58 }
 0x101   : > { %805 = vst.msk [vmem:[%s414_s20] sm:$0xff] %vm804_vm3, %v799_v2  ;;  %v812_v3 = vsel %vm804_vm3, %v799_v2, 0.0  ;;  %v819_v4 = vmul.f32 %v799_v2, %v799_v2 }
 0x102   : > { %v813_v5 = vrot.slane %v812_v3, 4 }
 0x103   : > { %v820_v6 = vsel %vm804_vm3, %v819_v4, 0.0 }
 0x104   : > { %v814_v7 = vadd.f32 %v813_v5, %v812_v3  ;;  %v821_v8 = vrot.slane %v820_v6, 4 }
 0x106   : > { %v815_v9 = vrot.slane %v814_v7, 2  ;;  %v822_v10 = vadd.f32 %v821_v8, %v820_v6 }
 0x108   : > { %v816_v11 = vadd.f32 %v815_v9, %v814_v7  ;;  %v823_v12 = vrot.slane %v822_v10, 2 }
 0x10a   : > { %v817_v13 = vrot.slane %v816_v11, 1  ;;  %v824_v14 = vadd.f32 %v823_v12, %v822_v10 }
 0x10c   : > { %v825_v15 = vrot.slane %v824_v14, 1  ;;  %v818_v16 = vadd.f32 %v817_v13, %v816_v11 }
 0x10e   : > { %v826_v17 = vadd.f32 %v825_v15, %v824_v14 }
 0x110   : > { %v828_v18 = vsel %vm827_vm4, %v818_v16, %v826_v17 }
 0x111   : > { %830 = vst.msk [vmem:[%s421_s0] sm:$0x3] %vm829_vm5, %v828_v18 }
 0x112 PF: > { %s18_s2 = sadd.s32 1, %s1137_s2   ;;  %s1327_s23 = smov %s1133_s24 }
 0x113   : > { %p15_p5 = scmp.ge.s32.totalorder %s18_s2, 4   ;;  %s1328_s24 = smov %s1330_s25 }
 0x115   :  { %17 = sbr.rel (!%p15_p5) target bundleno = 2 (0x2), region = 92 }

// kernel: cbhg_forward.8
= control target key start
LH: loop header
LB: loop body
LE: loop exit
PB: predicated region body
PF: predicated region fallthrough
CT: control target
= control target key end

     0   :  { %s1029_s13 = smov 0   ;;  %s1031_s14 = smov 0   ;;  %s1149_s0 = inlined_call_operand.vmem [shape: f32[2,8,32], index: 0, kind: input, shape index: {}]   ;;  %s1150_s1 = inlined_call_operand.vmem [shape: f32[2,8,32], index: 1, kind: input, shape index: {}]   ;;  %s1151_s2 = inlined_call_operand.vmem [shape: f32[1,32], index: 2, kind: input, shape index: {}]   ;;  %s1152_s3 = inlined_call_operand.vmem [shape: f32[1,32], index: 3, kind: input, shape index: {}]   ;;  %s1153_s4 = inlined_call_operand.vmem [shape: bf16[32,192], index: 4, kind: input, shape index: {}]   ;;  %s1154_s5 = inlined_call_operand.vmem [shape: f32[1,192], index: 5, kind: input, shape index: {}]   ;;  %s1155_s6 = inlined_call_operand.vmem [shape: bf16[32,64], index: 6, kind: input, shape index: {}]   ;;  %s1156_s7 = inlined_call_operand.vmem [shape: f32[1,64], index: 7, kind: input, shape index: {}]   ;;  %s1157_s8 = inlined_call_operand.vmem [shape: bf16[32,64], index: 8, kind: input, shape index: {}]   ;;  %s1158_s9 = inlined_call_operand.vmem [shape: f32[1,64], index: 9, kind: input, shape index: {}]   ;;  %s1159_s10 = inlined_call_operand.vmem [shape: f32[2,2,8,96], index: 10, kind: output, shape index: {}]  }
   0x1   :  { %s1033_s15 = smov 0   ;;  %s1035_s16 = smov 0  }
   0x2   :  { %s1037_s17 = smov 0  }
   0x3 LB: > { %s814_s18 = sadd.s32 4294967295, %s967_s17   ;;  %s32_s19 = sadd.s32 1, %s963_s16  ;;  %s967_s17 = sphi %s1037_s17, %s20_s17   ;;  %s963_s16 = sphi %s1035_s16, %s1164_s16   ;;  %s959_s15 = sphi %s1033_s15, %s1163_s15   ;;  %s955_s14 = sphi %s1031_s14, %s1162_s14   ;;  %s951_s13 = sphi %s1029_s13, %s1161_s13  }
   0x4   : > { %p34_p0 = scmp.ge.s32.totalorder %s32_s19, 2  ;;  %s265_s20 = sadd.s32 1, %s955_s14 }
   0x5   : > { %p275_p1 = scmp.ne.s32.totalorder %s955_s14, %s951_s13  ;;  %p276_p2 = scmp.eq.s32.totalorder %s814_s18, 1 }
   0x6   : > { %s1166_s19 = smov (%p34_p0, %s32_s19), 0  ;;  %p818_p4 = scmp.ge.s32.totalorder %s967_s17, 1 }
   0x7   : > { %p1061_p3 = por %p276_p2, %p275_p1  ;;  %s260_s22 = ssub.s32 %s963_s16, %s1166_s19 }
   0x8   : > { %p344_p5 = scmp.lt.s32.totalorder %s967_s17, 3  ;;  %p263_p6 = scmp.eq.s32.totalorder %s260_s22, 0 }
   0xa   : > { %p345_p7 = pnand %p818_p4, %p344_p5 }
   0xb   : > { %s1070_s23 = scalar_select %p263_p6, %s955_s14, %s265_s20  }
   0xc   : > { %348 = sbr.rel (%p345_p7) target bundleno = 1102 (0x44e), region = 60  ;;  %v911_v0 = vld [vmem:[%s1155_s6] sm:$0xff] (!%p345_p7)   ;;  %v969_v1 = vmov (!%p345_p7), 0.0   ;;  %v912_v2 = vld [vmem:[%s1155_s6 + $0x8] sm:$0xff] (!%p345_p7)   ;;  %vm970_vm0 = vmmov (!%p345_p7), 0   ;;  %p390_p8 = scmp.lt.s32.totalorder (!%p345_p7), %s959_s15, 1  ;;  %v604_v54 = vlaneseq (!%p345_p7) }
   0xd   : > { %850 = vmatprep.subr.bf16.mxu0 (!%p345_p7), %v969_v1  ;;  %858 = vmatprep.subr.bf16.mxu1 (!%p345_p7), %v969_v1  ;;  %v822_v3 = vld [vmem:[%s1151_s2] ss:$0 sm:$0xff] (!%p345_p7)  ;;  %vm448_vm1 = vcmask (!%p345_p7), 261120   ;;  %v914_v21 = vld [vmem:[%s1157_s8 + $0x8] sm:$0xff] (!%p345_p7)   ;;  %v920_v42 = vld [vmem:[%s1153_s4 + $0x14] ss:$8 sps:$4 sm:$0xff] (!%p345_p7)  }
   0xe   : > { %851 = vmatpush3.bf16.msra.mxu0 (!%p345_p7), %v911_v0  ;;  %854 = vmatprep.mubr.msk.bf16.mxu0 (!%p345_p7), %vm970_vm0, %v969_v1  ;;  %v823_v5 = vld [vmem:[%s1152_s3] ss:$0 sm:$0xff] (!%p345_p7)  ;;  %v917_v41 = vld [vmem:[%s1153_s4 + $0x4] ss:$8 sps:$4 sm:$0xff] (!%p345_p7)   ;;  %v918_v43 = vld [vmem:[%s1153_s4 + $0x10] ss:$8 sps:$4 sm:$0xff] (!%p345_p7)  }
   0xf   : > { %852 = vmatprep.subr.bf16.mxu0 (!%p345_p7), %v969_v1  ;;  %862 = vmatprep.mubr.msk.bf16.mxu1 (!%p345_p7), %vm970_vm0, %v969_v1  ;;  %v824_v11 = vld [vmem:[%s1156_s7] ss:$0 sm:$0xff] (!%p345_p7)  ;;  %v972_v44 = vmov (!%p345_p7), 0   ;;  %v605_v55 = vshrl.u32 (!%p345_p7), %v604_v54, 7  ;;  %s387_s18 = sand.u32 (!%p345_p7), 1, %s951_s13   ;;  %vm678_vm2 = vcmask (!%p345_p7), 785408  }
  0x10   : > { %v913_v20 = vld [vmem:[%s1157_s8] sm:$0xff] (!%p345_p7)   ;;  %s973_s26 = smov (!%p345_p7), 32  }
  0x11   : > { %859 = vmatpush3.bf16.msra.mxu1 (!%p345_p7), %v913_v20  ;;  %v829_v31 = vld [vmem:[%s1158_s9] ss:$0 sm:$0xff] (!%p345_p7)  ;;  %v606_v56 = vsub.s32 (!%p345_p7), 0, %v605_v55  ;;  %v610_v58 = vsub.s32 (!%p345_p7), 1, %v605_v55 }
  0x12   : > { %853 = vmatpush3.bf16.msra.mxu0 (!%p345_p7), %v912_v2  ;;  %860 = vmatprep.subr.bf16.mxu1 (!%p345_p7), %v969_v1  ;;  %v915_v40 = vld [vmem:[%s1153_s4] ss:$8 sps:$4 sm:$0xff] (!%p345_p7)  }
  0x13   : > { %s391_s28 = scalar_select %p390_p8, %s959_s15, 1  ;;  %637 = vmatprep.subr.bf16.mxu0 %v917_v41  ;;  %v602_v57 = vld [vmem:[%s1154_s5] sm:$0x3] }
  0x14   : > { %v607_v59 = vrot.slane %v602_v57, %v606_v56  ;;  %v611_v60 = vrot.slane %v602_v57, %v610_v58  ;;  %s841_s13 = sshll.u32 (%p1061_p3), %s959_s15, 3 }
  0x15   : > { %s820_s29 = sshll.u32 %s391_s28, 3  ;;  %861 = vmatpush3.bf16.msra.mxu1 %v914_v21  ;;  %s699_s30 = scalar_lea.vmem (%p1061_p3), %s1159_s10, %s841_s13 }
  0x16   : > { %s396_s20 = scalar_lea.vmem %s1149_s0, %s820_s29  ;;  %s403_s25 = scalar_lea.vmem %s1150_s1, %s820_s29 }
  0x17   : > { %v405_v4 = vld [vmem:[%s396_s20] sm:$0xff]  ;;  %s971_s20 = smov 96  }
  0x18   : > { %v413_v6 = vmul.f32 %v822_v3, %v405_v4  ;;  %v422_v7 = vld [vmem:[%s403_s25] sm:$0xff]  ;;  %s819_s25 = sshll.u32 %s387_s18, 4 }
  0x1a   : > { %v421_v8 = vadd.f32 %v823_v5, %v413_v6 }
  0x1c   : > { %v423_v9 = vadd.f32 %v422_v7, %v421_v8 }
  0x1e   : > { %v429_v10 = vpack.c.bf16 %v423_v9, %v423_v9 }
  0x20   : > { %855 = vmatmul.mubr.msk.bf16.vlgmr.msra.gmra.mrb[0].mxu0 %vm448_vm1, %v429_v10 }
  0x21   : > { %638 = vmatpush1.bf16.msra.mxu0 %v915_v40  ;;  %669 = vmatprep.mubr.bf16.mxu0 %v972_v44 }
  0x22   : > { %639 = vmatprep.subr.bf16.mxu0 %v920_v42 }
  0x25   : > { %640 = vmatpush1.bf16.msra.mxu0 %v918_v43 }
  0xf3   : > { %v486_v12 = vpop.f32.mrb[0].mxu0 }
  0xf4   : > { %v487_v13 = vadd.f32 %v824_v11, %v486_v12  ;;  %v856_v14 = vpop.f32.mrb[1].mxu0 }
  0xf5   : > { %v489_v15 = vpop.f32.mrb[2].mxu0 }
  0xf6   : > { %v828_v16 = vmul.f32 -1.442695, %v487_v13  ;;  %v857_v17 = vpop.f32.mrb[3].mxu0  ;;  %v492_v25 = vmax.f32 %v487_v13, 0.0 }
  0xf8   : > { %921 = vpow2.f32 %v828_v16 }
 0x102   : > { %v922_v18 = vpop.eup %921 }
 0x103   : > { %v496_v19 = vadd.f32 1.0, %v922_v18 }
 0x105   : > { %923 = vrcp.f32 %v496_v19 }
 0x10f   : > { %v924_v22 = vpop.eup %923 }
 0x110   : > { %500 = vrot.lane.b32.xlu0 %v924_v22, %s971_s20  ;;  %v504_v23 = vsub.f32 1.0, %v924_v22 }
 0x114   : > { %506 = vrot.lane.b32.xlu0 %v504_v23, %s971_s20 }
 0x182   : > { %v501_v24 = vpop.permute.xlu0 %500 }
 0x183   : > { %v503_v27 = vmul.f32 %v501_v24, %v492_v25 }
 0x186   : > { %v507_v26 = vpop.permute.xlu0 %506 }
 0x187   : > { %v509_v28 = vmul.f32 %v507_v26, %v423_v9 }
 0x189   : > { %v510_v29 = vadd.f32 %v509_v28, %v503_v27 }
 0x18b   : > { %v516_v30 = vpack.c.bf16 %v510_v29, %v510_v29 }
 0x18d   : > { %863 = vmatmul.mubr.msk.bf16.vlgmr.msra.gmra.mrb[0].mxu1 %vm448_vm1, %v516_v30 }
 0x260   : > { %v572_v32 = vpop.f32.mrb[0].mxu1 }
 0x261   : > { %v573_v33 = vadd.f32 %v829_v31, %v572_v32  ;;  %v864_v34 = vpop.f32.mrb[1].mxu1 }
 0x262   : > { %v575_v35 = vpop.f32.mrb[2].mxu1 }
 0x263   : > { %v833_v36 = vmul.f32 -1.442695, %v573_v33  ;;  %v865_v37 = vpop.f32.mrb[3].mxu1  ;;  %v578_v48 = vmax.f32 %v573_v33, 0.0 }
 0x265   : > { %925 = vpow2.f32 %v833_v36 }
 0x26f   : > { %v926_v38 = vpop.eup %925 }
 0x270   : > { %v582_v39 = vadd.f32 1.0, %v926_v38 }
 0x272   : > { %927 = vrcp.f32 %v582_v39 }
 0x27c   : > { %v928_v45 = vpop.eup %927 }
 0x27d   : > { %586 = vrot.lane.b32.xlu1 %v928_v45, %s971_s20  ;;  %v590_v46 = vsub.f32 1.0, %v928_v45 }
 0x281   : > { %592 = vrot.lane.b32.xlu1 %v590_v46, %s971_s20  ;;  %s389_s20 = scalar_lea.vmem [#allocation2], %s819_s25 }
 0x2ef   : > { %v587_v47 = vpop.permute.xlu1 %586 }
 0x2f0   : > { %v589_v50 = vmul.f32 %v587_v47, %v578_v48 }
 0x2f3   : > { %v593_v49 = vpop.permute.xlu1 %592 }
 0x2f4   : > { %v595_v51 = vmul.f32 %v593_v49, %v510_v29 }
 0x2f6   : > { %v596_v52 = vadd.f32 %v595_v51, %v589_v50 }
 0x2f8   : > { %v597_v53 = vpack.c.bf16 %v596_v52, %v596_v52 }
 0x2fa   : > { %838 = vmatmul.mubr.msk.bf16.vlgmr.msra.gmra.mrb[4].mxu0 %vm448_vm1, %v597_v53 }
 0x3cd   : > { %v671_v61 = vpop.f32.mrb[4].mxu0 }
 0x3ce   : > { %v672_v62 = vadd.f32 %v671_v61, %v607_v59  ;;  %v673_v63 = vpop.f32.mrb[5].mxu0 }
 0x3cf   : > { %v674_v0 = vadd.f32 %v673_v63, %v611_v60  ;;  %v675_v1 = vpop.f32.mrb[6].mxu0 }
 0x3d0   : > { %679 = vst.msk [vmem:[%s389_s20] sm:$0xff] %vm678_vm2, %v672_v62  ;;  %v676_v2 = vpop.f32.mrb[7].mxu0  ;;  %682 = vrot.lane.b32.xlu0 %v672_v62, %s973_s26 }
 0x3d1   : > { %684 = vrot.lane.b32.xlu1 %v674_v0, %s973_s26 }
 0x3d7   : > { %v729_v6 = vld [vmem:[%s389_s20] sm:$0xff] (%p1061_p3) }
 0x3d8   : > { %730 = vst [vmem:[%s699_s30] sm:$0xff] (%p1061_p3), %v729_v6 }
 0x43f   : > { %696 = sbr.rel (!%p1061_p3) target bundleno = 1102 (0x44e), region = 64 }
 0x442   : > { %v683_v3 = vpop.permute.xlu0 %682 }
 0x443   : > { %v685_v4 = vpop.permute.xlu1 %684 }
 0x444   : > { %v686_v5 = vsel %vm448_vm1, %v683_v3, %v685_v4 }
 0x445   : > { %839 = vst.msk [vmem:[%s389_s20 + $0x8] sm:$0xff] %vm678_vm2, %v686_v5 }
 0x44c   : > { %v731_v7 = vld [vmem:[%s389_s20 + $0x8] sm:$0xff] }
 0x44d   : > { %732 = vst [vmem:[%s699_s30 + $0x10] sm:$0xff] %v731_v7 }
 0x44e PF: > { %s20_s17 = sadd.s32 1, %s967_s17   ;;  %s1161_s13 = smov %s955_s14 }
 0x44f   : > { %p17_p9 = scmp.ge.s32.totalorder %s20_s17, 4   ;;  %s1162_s14 = smov %s1070_s23 }
 0x450   : > { %s1163_s15 = smov %s963_s16  ;;  %s1164_s16 = smov %s1166_s19 }
 0x451   :  { %19 = sbr.rel (!%p17_p9) target bundleno = 3 (0x3), region = 132 }

// kernel: cbhg_forward.9
= control target key start
LH: loop header
LB: loop body
LE: loop exit
PB: predicated region body
PF: predicated region fallthrough
CT: control target
= control target key end

     0   :  { %s688_s12 = smov 0   ;;  %s690_s13 = smov 0   ;;  %s786_s0 = inlined_call_operand.vmem [shape: f32[2,8,2,96], index: 0, kind: input, shape index: {}]   ;;  %s787_s1 = inlined_call_operand.vmem [shape: bf16[2,32,96], index: 1, kind: input, shape index: {}]   ;;  %s788_s2 = inlined_call_operand.vmem [shape: f32[2,1,96], index: 2, kind: input, shape index: {}]   ;;  %s789_s3 = inlined_call_operand.vmem [shape: f32[2,8,2,32], index: 3, kind: output, shape index: {}]  }
   0x1   :  { %s692_s14 = smov 0  }
   0x2 LB: > { %s25_s15 = sadd.s32 1, %s652_s13  ;;  %p554_p0 = scmp.ge.s32.totalorder %s656_s14, 1  ;;  %s656_s14 = sphi %s692_s14, %s13_s14   ;;  %s652_s13 = sphi %s690_s13, %s791_s13   ;;  %s648_s12 = sphi %s688_s12, %s790_s12  }
   0x3   : > { %p27_p1 = scmp.ge.s32.totalorder %s25_s15, 2  ;;  %p194_p2 = scmp.lt.s32.totalorder %s656_s14, 3 }
   0x5   : > { %s793_s15 = smov (%p27_p1, %s25_s15), 0  ;;  %p195_p3 = pnand %p554_p0, %p194_p2 }
   0x6   : > { %p244_p4 = scmp.lt.s32.totalorder (!%p195_p3), %s648_s12, 1  ;;  %vm285_vm0 = vcmask (!%p195_p3), 254976   ;;  %s563_s16 = sshll.u32 (!%p195_p3), %s648_s12, 1  ;;  %v662_v0 = vmov (!%p195_p3), 0.0  }
   0x7   : > { %198 = sbr.rel (%p195_p3) target bundleno = 728 (0x2d8), region = 32  ;;  %286 = vst.msk [vmem:[#allocation2] sm:$0x3] (!%p195_p3), %vm285_vm0, %v662_v0  ;;  %s711_s17 = ssub.s32 (!%p195_p3), 1, %s563_s16 }
   0x8   : > { %s741_s5 = smov (!%p195_p3), 0  }
   0xe   : > { %s245_s18 = scalar_select %p244_p4, %s648_s12, 1 }
  0x10   : > { %s714_s19 = sshll.u32 %s245_s18, 4  ;;  %s263_s22 = scalar_lea.vmem %s788_s2, %s245_s18 }
  0x11   : > { %s251_s25 = scalar_lea.vmem %s786_s0, %s714_s19  ;;  %s260_s28 = scalar_lea.vmem %s787_s1, %s714_s19  ;;  %v727_v1 = vld [vmem:[%s263_s22] ss:$0 sm:$0xff] }
  0x12   : > { %s275_s4 = scalar_lea.vmem %s789_s3, %s714_s19  ;;  %v733_v2 = vld [vmem:[%s260_s28] sm:$0xf]  ;;  %v735_v3 = vld [vmem:[%s260_s28 + $0x4] sm:$0xf]  ;;  %v737_v4 = vld [vmem:[%s260_s28 + $0x8] sm:$0xf] }
  0x13   : > { %v739_v5 = vld [vmem:[%s260_s28 + $0xc] sm:$0xf] }
  0x14 LB: >> { %v566_v6 = vcombine.low %v733_v2, %v735_v3  ;;  %v663_v7 = vmov 0.0   ;;  %vm664_vm1 = vmmov 0   ;;  %v567_v8 = vcombine.low %v737_v4, %v739_v5  ;;  %v308_v9 = vld [vmem:[#allocation2] sm:$0x3]  ;;  %s665_s6 = smov 64   ;;  %s302_s7 = smul.u32 7, %s648_s12  ;;  %s660_s5 = sphi %s741_s5, %s301_s5  }
  0x15   : >> { %578 = vmatprep.subr.bf16.mxu0 %v663_v7  ;;  %582 = vmatprep.mubr.msk.bf16.mxu0 %vm664_vm1, %v663_v7  ;;  %v309_v10 = vpack.c.bf16 %v308_v9, %v308_v9  ;;  %vm328_vm2 = vcmask 261120   ;;  %s303_s8 = smul.u32 %s660_s5, %s711_s17  ;;  %s666_s20 = smov 96  }
  0x16   : >> { %579 = vmatpush3.bf16.msra.mxu0 %v566_v6  ;;  %s667_s21 = smov 32   ;;  %s301_s5 = sadd.s32 1, %s660_s5  }
  0x17   : >> { %580 = vmatprep.subr.bf16.mxu0 %v663_v7  ;;  %s754_s9 = sadd.s32 %s303_s8, %s302_s7  ;;  %p298_p6 = scmp.ge.s32.totalorder %s301_s5, 8  }
  0x18   : >> { %s564_s10 = sshll.u32 %s754_s9, 1  ;;  %p403_p5 = scmp.lt.s32.totalorder %s754_s9, 8 }
  0x19   : >> { %s306_s18 = scalar_lea.vmem %s251_s25, %s564_s10  ;;  %s414_s26 = scalar_lea.vmem %s275_s4, %s564_s10 }
  0x1a   : >> { %581 = vmatpush3.bf16.msra.mxu0 %v567_v8  ;;  %v307_v16 = vld [vmem:[%s306_s18] sm:$0x3]  ;;  %s404_s22 = scalar_select %p403_p5, 1, 0 }
  0x1c   : >> { %v405_v29 = vstv %s404_s22 }
  0x1d   : >> { %583 = vmatmul.mubr.msk.bf16.vlgmr.msra.gmra.mrb[0].mxu0 %vm328_vm2, %v309_v10  ;;  %vm406_vm3 = vcmp.eq.s32.totalorder %v405_v29, 1 }
  0xf0   : >> { %v366_v11 = vpop.f32.mrb[0].mxu0 }
  0xf1   : >> { %v367_v12 = vadd.f32 %v727_v1, %v366_v11  ;;  %v584_v13 = vpop.f32.mrb[1].mxu0 }
  0xf2   : >> { %v369_v14 = vpop.f32.mrb[2].mxu0 }
  0xf3   : >> { %380 = vrot.lane.b32.xlu0 %v367_v12, %s665_s6  ;;  %v585_v15 = vpop.f32.mrb[3].mxu0  ;;  %v372_v17 = vadd.f32 %v367_v12, %v307_v16 }
  0xf5   : >> { %v569_v18 = vmul.f32 -1.442695, %v372_v17 }
  0xf7   : >> { %624 = vpow2.f32 %v569_v18 }
 0x101   : >> { %v625_v19 = vpop.eup %624 }
 0x102   : >> { %v376_v20 = vadd.f32 1.0, %v625_v19 }
 0x104   : >> { %626 = vrcp.f32 %v376_v20 }
 0x10e   : >> { %v627_v21 = vpop.eup %626 }
 0x10f   : >> { %v390_v28 = vsub.f32 1.0, %v627_v21 }
 0x165   : >> { %v381_v22 = vpop.permute.xlu0 %380 }
 0x166   : >> { %v383_v23 = vmul.f32 %v627_v21, %v381_v22 }
 0x168   : >> { %385 = vrot.lane.b32.xlu0 %v383_v23, %s665_s6 }
 0x1da   : >> { %v386_v24 = vpop.permute.xlu0 %385 }
 0x1db   : >> { %v388_v25 = vadd.f32 %v386_v24, %v307_v16 }
 0x1dd   : >> { %628 = vtanh.f32 %v388_v25 }
 0x1e7   : >> { %v629_v26 = vpop.eup %628 }
 0x1e8   : >> { %392 = vrot.lane.b32.xlu1 %v629_v26, %s666_s20 }
 0x1ec   : >> { %397 = vrot.lane.b32.xlu1 %v308_v9, %s667_s21 }
 0x25a   : >> { %v393_v27 = vpop.permute.xlu1 %392 }
 0x25b   : >> { %v395_v31 = vmul.f32 %v393_v27, %v390_v28 }
 0x25e   : >> { %v398_v30 = vpop.permute.xlu1 %397 }
 0x25f   : >> { %v400_v32 = vmul.f32 %v627_v21, %v398_v30 }
 0x261   : >> { %v401_v33 = vadd.f32 %v400_v32, %v395_v31 }
 0x263   : >> { %v407_v34 = vsel %vm406_vm3, %v401_v33, %v398_v30 }
 0x264   : >> { %409 = vrot.lane.b32.xlu0 %v407_v34, %s666_s20 }
 0x2d1   : > { %300 = sbr.rel (!%p298_p6) target bundleno = 20 (0x14), region = 81 }
 0x2d6   : >> { %v410_v35 = vpop.permute.xlu0 %409 }
 0x2d7   : >> { %413 = vst.msk [vmem:[#allocation2] sm:$0x3] %vm285_vm0, %v410_v35  ;;  %415 = vst.msk [vmem:[%s414_s26] sm:$0x3] %vm285_vm0, %v410_v35 }
 0x2d8 PF: > { %s13_s14 = sadd.s32 1, %s656_s14   ;;  %s790_s12 = smov %s652_s13 }
 0x2d9   : > { %p10_p7 = scmp.ge.s32.totalorder %s13_s14, 4   ;;  %s791_s13 = smov %s793_s15 }
 0x2db   :  { %12 = sbr.rel (!%p10_p7) target bundleno = 2 (0x2), region = 92 }

</bundles_post_ra>
